<compile_context>
chip_gen: v7x
topology: tpu7x:2x2x1
jax: 0.10.0
libtpu: 0.0.40
codegen_flags: <defaults>
</compile_context>

<pallas_src>
import math
from functools import partial

import jax
import jax.numpy as jnp
from jax.experimental import pallas as pl
from jax.experimental.pallas import tpu as pltpu

_BN_EPS = 1e-5


def _round_up(x, m):
    return (x + m - 1) // m * m


# ---------------------------------------------------------------------------
# Fused Pallas GEMM kernels:  out = act((A @ B) + shift)
# ---------------------------------------------------------------------------
def _epilogue(z, shift, apply_silu):
    z = z + shift
    if apply_silu:
        # SiLU = z * sigmoid(z); the divide goes to the (otherwise idle) EUP.
        z = z * pl.reciprocal(1.0 + jnp.exp(-z), approx=True)
    return z


def _matmul_single_k_kernel(a_ref, b_ref, shift_ref, o_ref, *, apply_silu):
    # Whole K fits one block: no scratch accumulator, no reduction grid axis.
    z = jnp.dot(a_ref[...], b_ref[...], preferred_element_type=jnp.float32)
    o_ref[...] = _epilogue(z, shift_ref[...], apply_silu).astype(o_ref.dtype)


def _matmul_multi_k_kernel(a_ref, b_ref, shift_ref, o_ref, acc_ref, *, apply_silu):
    k = pl.program_id(1)

    @pl.when(k == 0)
    def _():
        acc_ref[...] = jnp.zeros_like(acc_ref)

    acc_ref[...] += jnp.dot(a_ref[...], b_ref[...],
                            preferred_element_type=jnp.float32)

    @pl.when(k == pl.num_programs(1) - 1)
    def _():
        o_ref[...] = _epilogue(acc_ref[...], shift_ref[...],
                               apply_silu).astype(o_ref.dtype)


def fused_matmul(a, b, shift, *, apply_silu, tile_m=256, tile_k_max=512,
                 out_dtype=jnp.float32):
    """act(a @ b + shift).   a:(M,K)  b:(K,N)  shift:(N,)."""
    M, K = a.shape
    K2, N = b.shape
    assert K == K2
    Np = _round_up(N, 128)                       # lane-dense output stores
    tile_m = min(tile_m, _round_up(M, 8))
    Mp = _round_up(M, tile_m)

    multi_k = K > tile_k_max
    if multi_k:
        tile_k = tile_k_max                      # multiple of 128
        Kp = _round_up(K, tile_k)
    else:                                        # single K step, full-dim block
        tile_k = K
        Kp = K

    a = a.astype(jnp.bfloat16)                   # halve HBM/VMEM traffic, 2x MXU
    b = b.astype(jnp.bfloat16)
    if (Mp, Kp) != (M, K):
        a = jnp.pad(a, ((0, Mp - M), (0, Kp - K)))
    if (Kp, Np) != (K, N):
        b = jnp.pad(b, ((0, Kp - K), (0, Np - N)))
    shift = jnp.pad(shift.reshape(1, N).astype(jnp.float32),
                    ((0, 0), (0, Np - N)))

    if multi_k:
        grid = (Mp // tile_m, Kp // tile_k)
        out = pl.pallas_call(
            partial(_matmul_multi_k_kernel, apply_silu=apply_silu),
            out_shape=jax.ShapeDtypeStruct((Mp, Np), out_dtype),
            grid=grid,
            in_specs=[
                pl.BlockSpec((tile_m, tile_k), lambda i, k: (i, k)),
                pl.BlockSpec((tile_k, Np), lambda i, k: (k, 0)),
                pl.BlockSpec((1, Np), lambda i, k: (0, 0)),
            ],
            out_specs=pl.BlockSpec((tile_m, Np), lambda i, k: (i, 0)),
            scratch_shapes=[pltpu.VMEM((tile_m, Np), jnp.float32)],
            compiler_params=pltpu.CompilerParams(
                dimension_semantics=("parallel", "arbitrary")),
        )(a, b, shift)
    else:
        grid = (Mp // tile_m,)
        out = pl.pallas_call(
            partial(_matmul_single_k_kernel, apply_silu=apply_silu),
            out_shape=jax.ShapeDtypeStruct((Mp, Np), out_dtype),
            grid=grid,
            in_specs=[
                pl.BlockSpec((tile_m, Kp), lambda i: (i, 0)),
                pl.BlockSpec((Kp, Np), lambda i: (0, 0)),
                pl.BlockSpec((1, Np), lambda i: (0, 0)),
            ],
            out_specs=pl.BlockSpec((tile_m, Np), lambda i: (i, 0)),
            compiler_params=pltpu.CompilerParams(
                dimension_semantics=("parallel",)),
        )(a, b, shift)

    if Np != N:
        out = out[:, :N]
    if Mp != M:
        out = out[:M]
    return out


# ---------------------------------------------------------------------------
# Layer wrappers (NHWC layout everywhere); BN scale folded into the weights.
# ---------------------------------------------------------------------------
def conv_bn_silu_1x1(x, p):
    N, H, W, Cin = x.shape
    Cout = p['w'].shape[0]
    w2d = (p['w'].reshape(Cout, Cin) * p['scale'][:, None]).T   # (Cin, Cout)
    out = fused_matmul(x.reshape(N * H * W, Cin), w2d, p['shift'],
                       apply_silu=True)
    return out.reshape(N, H, W, Cout)


def conv_bn_silu_3x3(x, p):
    # stride 1, padding 1 ('same'), im2col in (ki, kj, c) order.
    N, H, W, Cin = x.shape
    Cout = p['w'].shape[0]
    xp = jnp.pad(x, ((0, 0), (1, 1), (1, 1), (0, 0)))
    cols = jnp.concatenate(
        [xp[:, i:i + H, j:j + W, :] for i in range(3) for j in range(3)], axis=-1)
    w = p['w'] * p['scale'][:, None, None, None]                # fold BN scale
    wt = w.transpose(2, 3, 1, 0).reshape(9 * Cin, Cout)         # (ki,kj,c) -> Cout
    out = fused_matmul(cols.reshape(N * H * W, 9 * Cin), wt, p['shift'],
                       apply_silu=True)
    return out.reshape(N, H, W, Cout)


def linear(x2d, w, b):
    # torch nn.Linear: y = x @ w.T + b   (no activation)
    return fused_matmul(x2d, w.T, b, apply_silu=False)


def depthwise_conv3x3(x, w, b):
    # TODO(synk): 3x3 depthwise ("lepe") conv kept as JAX shifted-adds — per-channel
    # conv has no GEMM structure worth a Pallas kernel at these sizes.
    N, H, W, C = x.shape
    xp = jnp.pad(x, ((0, 0), (1, 1), (1, 1), (0, 0)))
    wk = w.reshape(C, 3, 3)
    out = jnp.zeros_like(x)
    for i in range(3):
        for j in range(3):
            out = out + xp[:, i:i + H, j:j + W, :] * wk[:, i, j][None, None, None, :]
    return out + b[None, None, None, :]


# ---------------------------------------------------------------------------
# BiLevelRoutingAttention (identity kv-downsample, mul_weight='none', 'qkvo')
# ---------------------------------------------------------------------------
def bilevel_routing_attention(x, p, *, n_win, num_heads, topk):
    """Input/output NHWC (equivalent to the module's NCHW in/out, transposes hoisted)."""
    N, H_in, W_in, dim = x.shape
    qk_dim = dim
    scale = qk_dim ** (-0.5)

    pad_b = (n_win - H_in % n_win) % n_win
    pad_r = (n_win - W_in % n_win) % n_win
    if pad_b or pad_r:                                   # auto_pad=True
        x = jnp.pad(x, ((0, 0), (0, pad_b), (0, pad_r), (0, 0)))
    _, H, W, _ = x.shape
    h, w = H // n_win, W // n_win
    p2, w2 = n_win * n_win, h * w

    # window partition: 'n (j h) (i w) c -> n (j i) h w c'
    xw = x.reshape(N, n_win, h, n_win, w, dim).transpose(0, 1, 3, 2, 4, 5)
    xw = xw.reshape(N, p2, h, w, dim)

    # qkv projection (Pallas GEMM)
    qkv = linear(xw.reshape(-1, dim), p['qkv_w'], p['qkv_b'])
    qkv = qkv.reshape(N, p2, h, w, 2 * qk_dim + dim)
    q, kv = qkv[..., :qk_dim], qkv[..., qk_dim:]

    q_pix = q.reshape(N, p2, w2, qk_dim)
    kv_pix = kv.reshape(N, p2, w2, qk_dim + dim)         # kv_down = Identity

    q_win = q.mean(axis=(2, 3))                          # (N, p2, qk)
    k_win = kv[..., :qk_dim].mean(axis=(2, 3))           # (N, p2, qk)

    # lepe: depthwise conv over the full map on the V channels
    v_img = kv[..., qk_dim:].reshape(N, n_win, n_win, h, w, dim)
    v_img = v_img.transpose(0, 1, 3, 2, 4, 5).reshape(N, H, W, dim)
    lepe = depthwise_conv3x3(v_img, p['lepe_w'], p['lepe_b'])

    # TODO(synk): top-k routing + per-window KV gather kept in JAX (data-dependent
    # indices, no clean Pallas TPU mapping at these sizes).
    attn_logit = jnp.einsum('npc,nqc->npq', q_win * scale, k_win,
                            preferred_element_type=jnp.float32)
    topk_logit, r_idx = jax.lax.top_k(attn_logit, topk)
    _ = jax.nn.softmax(topk_logit, axis=-1)              # r_weight (mul_weight='none')

    batch_idx = jnp.arange(N)[:, None, None]
    kv_sel = kv_pix[batch_idx, r_idx]                    # (N, p2, topk, w2, qk+dim)
    k_sel, v_sel = kv_sel[..., :qk_dim], kv_sel[..., qk_dim:]

    m = num_heads
    cq, cv = qk_dim // m, dim // m
    k_sel = k_sel.reshape(N, p2, topk, w2, m, cq).transpose(0, 1, 4, 5, 2, 3)
    k_sel = k_sel.reshape(N * p2, m, cq, topk * w2)
    v_sel = v_sel.reshape(N, p2, topk, w2, m, cv).transpose(0, 1, 4, 2, 3, 5)
    v_sel = v_sel.reshape(N * p2, m, topk * w2, cv)
    q_h = q_pix.reshape(N, p2, w2, m, cq).transpose(0, 1, 3, 2, 4)
    q_h = q_h.reshape(N * p2, m, w2, cq)

    # TODO(synk): per-window attention is tiny (w2 x topk*w2, head dim dim/heads);
    # kept as JAX einsums rather than a Pallas kernel (kernel-step overhead would
    # dominate the ~0.3 MFLOP of work).
    attn = jnp.einsum('bmqc,bmck->bmqk', q_h * scale, k_sel,
                      preferred_element_type=jnp.float32)
    attn = jax.nn.softmax(attn, axis=-1)
    out = jnp.einsum('bmqk,bmkc->bmqc', attn, v_sel,
                     preferred_element_type=jnp.float32)  # (N*p2, m, w2, cv)

    # '(n j i) m (h w) c -> n (j h) (i w) (m c)'
    out = out.reshape(N, n_win, n_win, m, h, w, cv)
    out = out.transpose(0, 1, 4, 2, 5, 3, 6).reshape(N, H, W, dim)
    out = out + lepe

    out = linear(out.reshape(-1, dim), p['wo_w'], p['wo_b']).reshape(N, H, W, dim)
    if pad_b or pad_r:
        out = out[:, :H_in, :W_in, :]
    return out


# ---------------------------------------------------------------------------
# C2f_Bottleneck_ATT forward (NCHW in / NCHW out, NHWC internally)
# ---------------------------------------------------------------------------
def c2f_bottleneck_att_forward(x_nchw, params, *, c, n_win, shortcut, use_att,
                               num_heads, topk):
    x = jnp.transpose(x_nchw, (0, 2, 3, 1))              # single NCHW -> NHWC
    y = conv_bn_silu_1x1(x, params['cv1'])
    ys = [y[..., :c], y[..., c:]]                        # chunk(2, channel)
    cur = ys[-1]
    for bp in params['m']:                               # Bottleneck_ATT blocks
        z = conv_bn_silu_3x3(cur, bp['cv1'])
        z = conv_bn_silu_3x3(z, bp['cv2'])
        if use_att:
            z = bilevel_routing_attention(z, bp['att'], n_win=n_win,
                                          num_heads=num_heads, topk=topk)
        if shortcut:                                     # add = shortcut and c1==c2
            z = cur + z
        ys.append(z)
        cur = z
    out = conv_bn_silu_1x1(jnp.concatenate(ys, axis=-1), params['cv2'])
    return jnp.transpose(out, (0, 3, 1, 2))              # back to NCHW once


# ---------------------------------------------------------------------------
# Parameter construction (BN folded into scale/shift host-side)
# ---------------------------------------------------------------------------
def _conv_bn_params(key, cout, cin, k):
    kw, kg, kb, km, kv = jax.random.split(key, 5)
    fan_in = cin * k * k
    w = jax.random.normal(kw, (cout, cin, k, k), jnp.float32) / math.sqrt(fan_in)
    gamma = 1.0 + 0.1 * jax.random.normal(kg, (cout,), jnp.float32)
    beta = 0.1 * jax.random.normal(kb, (cout,), jnp.float32)
    mean = 0.05 * jax.random.normal(km, (cout,), jnp.float32)
    var = 1.0 + 0.1 * jax.random.uniform(kv, (cout,), jnp.float32)
    scale = gamma / jnp.sqrt(var + _BN_EPS)
    shift = beta - mean * scale
    return {'w': w, 'scale': scale, 'shift': shift}


def _linear_params(key, cout, cin):
    kw, kb = jax.random.split(key)
    bound = 1.0 / math.sqrt(cin)
    w = jax.random.uniform(kw, (cout, cin), jnp.float32, minval=-bound, maxval=bound)
    b = jax.random.uniform(kb, (cout,), jnp.float32, minval=-bound, maxval=bound)
    return w, b


def make_params(key, c1, c2, n, e=0.5):
    c = int(c2 * e)
    ki = iter(jax.random.split(key, 2 + 5 * n))
    params = {'cv1': _conv_bn_params(next(ki), 2 * c, c1, 1), 'm': []}
    for _ in range(n):
        dim = c                                            # ATT dim = qk_dim = c
        qkv_w, qkv_b = _linear_params(next(ki), 3 * dim, dim)
        wo_w, wo_b = _linear_params(next(ki), dim, dim)
        kl1, kl2 = jax.random.split(next(ki))
        lepe_w = jax.random.uniform(kl1, (dim, 1, 3, 3), jnp.float32,
                                    minval=-1.0 / 3.0, maxval=1.0 / 3.0)
        lepe_b = jax.random.uniform(kl2, (dim,), jnp.float32,
                                    minval=-1.0 / 3.0, maxval=1.0 / 3.0)
        params['m'].append({
            'cv1': _conv_bn_params(next(ki), c, c, 3),
            'cv2': _conv_bn_params(next(ki), c, c, 3),
            'att': {'qkv_w': qkv_w, 'qkv_b': qkv_b, 'wo_w': wo_w, 'wo_b': wo_b,
                    'lepe_w': lepe_w, 'lepe_b': lepe_b},
        })
    params['cv2'] = _conv_bn_params(next(ki), c2, (2 + n) * c, 1)
    return params


# ---------------------------------------------------------------------------
if __name__ == "__main__":
    key = jax.random.PRNGKey(0)
    N, C1, C2, H, W = 2, 16, 16, 16, 16
    n_blocks, e = 1, 0.5
    c = int(C2 * e)            # hidden channels = 8; also n_win of the attention

    kx, kp = jax.random.split(key)
    x = jax.random.normal(kx, (N, C1, H, W), jnp.float32)
    params = make_params(kp, C1, C2, n_blocks, e=e)

    fwd = jax.jit(partial(c2f_bottleneck_att_forward,
                          c=c, n_win=c, shortcut=False, use_att=True,
                          num_heads=4, topk=4))
    out = fwd(x, params)
    jax.block_until_ready(out)

    assert out.shape == (N, C2, H, W), out.shape
    assert bool(jnp.all(jnp.isfinite(out)))
    print("KERNEL_OK")
</pallas_src>

<mosaic_0001>
module attributes {stable_mosaic.version = 11 : i64} {
  func.func @_matmul_single_k_kernel(%arg0: i32, %arg1: memref<256x16xbf16, #tpu.memory_space<vmem>>, %arg2: memref<16x128xbf16, #tpu.memory_space<vmem>>, %arg3: memref<1x128xf32, #tpu.memory_space<vmem>>, %arg4: memref<256x128xf32, #tpu.memory_space<vmem>>) attributes {dimension_semantics = [#tpu.dimension_semantics<parallel>], iteration_bounds = array<i64: 2>, scalar_prefetch = 0 : i64, scratch_operands = 0 : i64, tpu.core_type = #tpu.core_type<tc>, window_params = [{transform_indices = @transform_0, window_bounds = array<i64: 256, 16>}, {pipeline_mode = #tpu.pipeline_mode<synchronous>, transform_indices = @transform_1, window_bounds = array<i64: 16, 128>}, {pipeline_mode = #tpu.pipeline_mode<synchronous>, transform_indices = @transform_2, window_bounds = array<i64: 1, 128>}, {transform_indices = @transform_3, window_bounds = array<i64: 256, 128>}]} {
    %c0 = arith.constant 0 : index
    %c0_0 = arith.constant 0 : index
    %0 = vector.load %arg1[%c0, %c0_0] : memref<256x16xbf16, #tpu.memory_space<vmem>>, vector<256x16xbf16>
    %c0_1 = arith.constant 0 : index
    %c0_2 = arith.constant 0 : index
    %1 = vector.load %arg2[%c0_1, %c0_2] : memref<16x128xbf16, #tpu.memory_space<vmem>>, vector<16x128xbf16>
    %cst = arith.constant dense<0.000000e+00> : vector<256x128xf32>
    %2 = tpu.matmul %0, %1, %cst {dimension_numbers = #tpu.dot_dimension_numbers<[1], [0], [0], [1], [0, 0, 1, 1], [], []>} : vector<256x16xbf16>, vector<16x128xbf16>, vector<256x128xf32> -> vector<256x128xf32>
    %c0_3 = arith.constant 0 : index
    %c0_4 = arith.constant 0 : index
    %3 = vector.load %arg3[%c0_3, %c0_4] : memref<1x128xf32, #tpu.memory_space<vmem>>, vector<1x128xf32>
    %4 = vector.broadcast %3 : vector<1x128xf32> to vector<256x128xf32>
    %5 = arith.addf %2, %4 : vector<256x128xf32>
    %cst_5 = arith.constant 0.000000e+00 : f32
    %6 = vector.broadcast %cst_5 : f32 to vector<256x128xf32>
    %7 = arith.subf %6, %5 : vector<256x128xf32>
    %8 = math.exp %7 : vector<256x128xf32>
    %cst_6 = arith.constant 1.000000e+00 : f32
    %9 = vector.broadcast %cst_6 : f32 to vector<256x128xf32>
    %10 = arith.addf %9, %8 : vector<256x128xf32>
    %11 = tpu.reciprocal %10 {approx = true} : vector<256x128xf32> -> vector<256x128xf32>
    %12 = arith.mulf %5, %11 : vector<256x128xf32>
    %c0_7 = arith.constant 0 : index
    %c0_8 = arith.constant 0 : index
    %13 = vector.load %arg4[%c0_7, %c0_8] : memref<256x128xf32, #tpu.memory_space<vmem>>, vector<256x128xf32>
    tpu.vector_store %arg4[%c0_7, %c0_8], %12 {strides = array<i32>} : memref<256x128xf32, #tpu.memory_space<vmem>>, vector<256x128xf32>,
    return
  }
  func.func @transform_0(%arg0: i32) -> (i32, i32) {
    %c0_i32 = arith.constant 0 : i32
    %c0_i32_0 = arith.constant 0 : i32
    return %arg0, %c0_i32 : i32, i32
  }
  func.func @transform_1(%arg0: i32) -> (i32, i32) {
    %c0_i32 = arith.constant 0 : i32
    %c0_i32_0 = arith.constant 0 : i32
    %c0_i32_1 = arith.constant 0 : i32
    return %c0_i32, %c0_i32_0 : i32, i32
  }
  func.func @transform_2(%arg0: i32) -> (i32, i32) {
    %c0_i32 = arith.constant 0 : i32
    %c0_i32_0 = arith.constant 0 : i32
    %c0_i32_1 = arith.constant 0 : i32
    return %c0_i32, %c0_i32_0 : i32, i32
  }
  func.func @transform_3(%arg0: i32) -> (i32, i32) {
    %c0_i32 = arith.constant 0 : i32
    %c0_i32_0 = arith.constant 0 : i32
    return %arg0, %c0_i32 : i32, i32
  }
}

module attributes {stable_mosaic.version = 11 : i64} {
  func.func @_matmul_single_k_kernel(%arg0: i32, %arg1: memref<256x72xbf16, #tpu.memory_space<vmem>>, %arg2: memref<72x128xbf16, #tpu.memory_space<vmem>>, %arg3: memref<1x128xf32, #tpu.memory_space<vmem>>, %arg4: memref<256x128xf32, #tpu.memory_space<vmem>>) attributes {dimension_semantics = [#tpu.dimension_semantics<parallel>], iteration_bounds = array<i64: 2>, scalar_prefetch = 0 : i64, scratch_operands = 0 : i64, tpu.core_type = #tpu.core_type<tc>, window_params = [{transform_indices = @transform_0, window_bounds = array<i64: 256, 72>}, {pipeline_mode = #tpu.pipeline_mode<synchronous>, transform_indices = @transform_1, window_bounds = array<i64: 72, 128>}, {pipeline_mode = #tpu.pipeline_mode<synchronous>, transform_indices = @transform_2, window_bounds = array<i64: 1, 128>}, {transform_indices = @transform_3, window_bounds = array<i64: 256, 128>}]} {
    %c0 = arith.constant 0 : index
    %c0_0 = arith.constant 0 : index
    %0 = vector.load %arg1[%c0, %c0_0] : memref<256x72xbf16, #tpu.memory_space<vmem>>, vector<256x72xbf16>
    %c0_1 = arith.constant 0 : index
    %c0_2 = arith.constant 0 : index
    %1 = vector.load %arg2[%c0_1, %c0_2] : memref<72x128xbf16, #tpu.memory_space<vmem>>, vector<72x128xbf16>
    %cst = arith.constant dense<0.000000e+00> : vector<256x128xf32>
    %2 = tpu.matmul %0, %1, %cst {dimension_numbers = #tpu.dot_dimension_numbers<[1], [0], [0], [1], [0, 0, 1, 1], [], []>} : vector<256x72xbf16>, vector<72x128xbf16>, vector<256x128xf32> -> vector<256x128xf32>
    %c0_3 = arith.constant 0 : index
    %c0_4 = arith.constant 0 : index
    %3 = vector.load %arg3[%c0_3, %c0_4] : memref<1x128xf32, #tpu.memory_space<vmem>>, vector<1x128xf32>
    %4 = vector.broadcast %3 : vector<1x128xf32> to vector<256x128xf32>
    %5 = arith.addf %2, %4 : vector<256x128xf32>
    %cst_5 = arith.constant 0.000000e+00 : f32
    %6 = vector.broadcast %cst_5 : f32 to vector<256x128xf32>
    %7 = arith.subf %6, %5 : vector<256x128xf32>
    %8 = math.exp %7 : vector<256x128xf32>
    %cst_6 = arith.constant 1.000000e+00 : f32
    %9 = vector.broadcast %cst_6 : f32 to vector<256x128xf32>
    %10 = arith.addf %9, %8 : vector<256x128xf32>
    %11 = tpu.reciprocal %10 {approx = true} : vector<256x128xf32> -> vector<256x128xf32>
    %12 = arith.mulf %5, %11 : vector<256x128xf32>
    %c0_7 = arith.constant 0 : index
    %c0_8 = arith.constant 0 : index
    %13 = vector.load %arg4[%c0_7, %c0_8] : memref<256x128xf32, #tpu.memory_space<vmem>>, vector<256x128xf32>
    tpu.vector_store %arg4[%c0_7, %c0_8], %12 {strides = array<i32>} : memref<256x128xf32, #tpu.memory_space<vmem>>, vector<256x128xf32>,
    return
  }
  func.func @transform_0(%arg0: i32) -> (i32, i32) {
    %c0_i32 = arith.constant 0 : i32
    %c0_i32_0 = arith.constant 0 : i32
    return %arg0, %c0_i32 : i32, i32
  }
  func.func @transform_1(%arg0: i32) -> (i32, i32) {
    %c0_i32 = arith.constant 0 : i32
    %c0_i32_0 = arith.constant 0 : i32
    %c0_i32_1 = arith.constant 0 : i32
    return %c0_i32, %c0_i32_0 : i32, i32
  }
  func.func @transform_2(%arg0: i32) -> (i32, i32) {
    %c0_i32 = arith.constant 0 : i32
    %c0_i32_0 = arith.constant 0 : i32
    %c0_i32_1 = arith.constant 0 : i32
    return %c0_i32, %c0_i32_0 : i32, i32
  }
  func.func @transform_3(%arg0: i32) -> (i32, i32) {
    %c0_i32 = arith.constant 0 : i32
    %c0_i32_0 = arith.constant 0 : i32
    return %arg0, %c0_i32 : i32, i32
  }
}

module attributes {stable_mosaic.version = 11 : i64} {
  func.func @_matmul_single_k_kernel(%arg0: i32, %arg1: memref<256x8xbf16, #tpu.memory_space<vmem>>, %arg2: memref<8x128xbf16, #tpu.memory_space<vmem>>, %arg3: memref<1x128xf32, #tpu.memory_space<vmem>>, %arg4: memref<256x128xf32, #tpu.memory_space<vmem>>) attributes {dimension_semantics = [#tpu.dimension_semantics<parallel>], iteration_bounds = array<i64: 2>, scalar_prefetch = 0 : i64, scratch_operands = 0 : i64, tpu.core_type = #tpu.core_type<tc>, window_params = [{transform_indices = @transform_0, window_bounds = array<i64: 256, 8>}, {pipeline_mode = #tpu.pipeline_mode<synchronous>, transform_indices = @transform_1, window_bounds = array<i64: 8, 128>}, {pipeline_mode = #tpu.pipeline_mode<synchronous>, transform_indices = @transform_2, window_bounds = array<i64: 1, 128>}, {transform_indices = @transform_3, window_bounds = array<i64: 256, 128>}]} {
    %c0 = arith.constant 0 : index
    %c0_0 = arith.constant 0 : index
    %0 = vector.load %arg1[%c0, %c0_0] : memref<256x8xbf16, #tpu.memory_space<vmem>>, vector<256x8xbf16>
    %c0_1 = arith.constant 0 : index
    %c0_2 = arith.constant 0 : index
    %1 = vector.load %arg2[%c0_1, %c0_2] : memref<8x128xbf16, #tpu.memory_space<vmem>>, vector<8x128xbf16>
    %cst = arith.constant dense<0.000000e+00> : vector<256x128xf32>
    %2 = tpu.matmul %0, %1, %cst {dimension_numbers = #tpu.dot_dimension_numbers<[1], [0], [0], [1], [0, 0, 1, 1], [], []>} : vector<256x8xbf16>, vector<8x128xbf16>, vector<256x128xf32> -> vector<256x128xf32>
    %c0_3 = arith.constant 0 : index
    %c0_4 = arith.constant 0 : index
    %3 = vector.load %arg3[%c0_3, %c0_4] : memref<1x128xf32, #tpu.memory_space<vmem>>, vector<1x128xf32>
    %4 = vector.broadcast %3 : vector<1x128xf32> to vector<256x128xf32>
    %5 = arith.addf %2, %4 : vector<256x128xf32>
    %c0_5 = arith.constant 0 : index
    %c0_6 = arith.constant 0 : index
    %6 = vector.load %arg4[%c0_5, %c0_6] : memref<256x128xf32, #tpu.memory_space<vmem>>, vector<256x128xf32>
    tpu.vector_store %arg4[%c0_5, %c0_6], %5 {strides = array<i32>} : memref<256x128xf32, #tpu.memory_space<vmem>>, vector<256x128xf32>,
    return
  }
  func.func @transform_0(%arg0: i32) -> (i32, i32) {
    %c0_i32 = arith.constant 0 : i32
    %c0_i32_0 = arith.constant 0 : i32
    return %arg0, %c0_i32 : i32, i32
  }
  func.func @transform_1(%arg0: i32) -> (i32, i32) {
    %c0_i32 = arith.constant 0 : i32
    %c0_i32_0 = arith.constant 0 : i32
    %c0_i32_1 = arith.constant 0 : i32
    return %c0_i32, %c0_i32_0 : i32, i32
  }
  func.func @transform_2(%arg0: i32) -> (i32, i32) {
    %c0_i32 = arith.constant 0 : i32
    %c0_i32_0 = arith.constant 0 : i32
    %c0_i32_1 = arith.constant 0 : i32
    return %c0_i32, %c0_i32_0 : i32, i32
  }
  func.func @transform_3(%arg0: i32) -> (i32, i32) {
    %c0_i32 = arith.constant 0 : i32
    %c0_i32_0 = arith.constant 0 : i32
    return %arg0, %c0_i32 : i32, i32
  }
}

module attributes {stable_mosaic.version = 11 : i64} {
  func.func @_matmul_single_k_kernel(%arg0: i32, %arg1: memref<256x24xbf16, #tpu.memory_space<vmem>>, %arg2: memref<24x128xbf16, #tpu.memory_space<vmem>>, %arg3: memref<1x128xf32, #tpu.memory_space<vmem>>, %arg4: memref<256x128xf32, #tpu.memory_space<vmem>>) attributes {dimension_semantics = [#tpu.dimension_semantics<parallel>], iteration_bounds = array<i64: 2>, scalar_prefetch = 0 : i64, scratch_operands = 0 : i64, tpu.core_type = #tpu.core_type<tc>, window_params = [{transform_indices = @transform_0, window_bounds = array<i64: 256, 24>}, {pipeline_mode = #tpu.pipeline_mode<synchronous>, transform_indices = @transform_1, window_bounds = array<i64: 24, 128>}, {pipeline_mode = #tpu.pipeline_mode<synchronous>, transform_indices = @transform_2, window_bounds = array<i64: 1, 128>}, {transform_indices = @transform_3, window_bounds = array<i64: 256, 128>}]} {
    %c0 = arith.constant 0 : index
    %c0_0 = arith.constant 0 : index
    %0 = vector.load %arg1[%c0, %c0_0] : memref<256x24xbf16, #tpu.memory_space<vmem>>, vector<256x24xbf16>
    %c0_1 = arith.constant 0 : index
    %c0_2 = arith.constant 0 : index
    %1 = vector.load %arg2[%c0_1, %c0_2] : memref<24x128xbf16, #tpu.memory_space<vmem>>, vector<24x128xbf16>
    %cst = arith.constant dense<0.000000e+00> : vector<256x128xf32>
    %2 = tpu.matmul %0, %1, %cst {dimension_numbers = #tpu.dot_dimension_numbers<[1], [0], [0], [1], [0, 0, 1, 1], [], []>} : vector<256x24xbf16>, vector<24x128xbf16>, vector<256x128xf32> -> vector<256x128xf32>
    %c0_3 = arith.constant 0 : index
    %c0_4 = arith.constant 0 : index
    %3 = vector.load %arg3[%c0_3, %c0_4] : memref<1x128xf32, #tpu.memory_space<vmem>>, vector<1x128xf32>
    %4 = vector.broadcast %3 : vector<1x128xf32> to vector<256x128xf32>
    %5 = arith.addf %2, %4 : vector<256x128xf32>
    %cst_5 = arith.constant 0.000000e+00 : f32
    %6 = vector.broadcast %cst_5 : f32 to vector<256x128xf32>
    %7 = arith.subf %6, %5 : vector<256x128xf32>
    %8 = math.exp %7 : vector<256x128xf32>
    %cst_6 = arith.constant 1.000000e+00 : f32
    %9 = vector.broadcast %cst_6 : f32 to vector<256x128xf32>
    %10 = arith.addf %9, %8 : vector<256x128xf32>
    %11 = tpu.reciprocal %10 {approx = true} : vector<256x128xf32> -> vector<256x128xf32>
    %12 = arith.mulf %5, %11 : vector<256x128xf32>
    %c0_7 = arith.constant 0 : index
    %c0_8 = arith.constant 0 : index
    %13 = vector.load %arg4[%c0_7, %c0_8] : memref<256x128xf32, #tpu.memory_space<vmem>>, vector<256x128xf32>
    tpu.vector_store %arg4[%c0_7, %c0_8], %12 {strides = array<i32>} : memref<256x128xf32, #tpu.memory_space<vmem>>, vector<256x128xf32>,
    return
  }
  func.func @transform_0(%arg0: i32) -> (i32, i32) {
    %c0_i32 = arith.constant 0 : i32
    %c0_i32_0 = arith.constant 0 : i32
    return %arg0, %c0_i32 : i32, i32
  }
  func.func @transform_1(%arg0: i32) -> (i32, i32) {
    %c0_i32 = arith.constant 0 : i32
    %c0_i32_0 = arith.constant 0 : i32
    %c0_i32_1 = arith.constant 0 : i32
    return %c0_i32, %c0_i32_0 : i32, i32
  }
  func.func @transform_2(%arg0: i32) -> (i32, i32) {
    %c0_i32 = arith.constant 0 : i32
    %c0_i32_0 = arith.constant 0 : i32
    %c0_i32_1 = arith.constant 0 : i32
    return %c0_i32, %c0_i32_0 : i32, i32
  }
  func.func @transform_3(%arg0: i32) -> (i32, i32) {
    %c0_i32 = arith.constant 0 : i32
    %c0_i32_0 = arith.constant 0 : i32
    return %arg0, %c0_i32 : i32, i32
  }
}

</mosaic_0001>

<bundles_post_ra>
// kernel: c2f_bottleneck_att_forward.6
= control target key start
LH: loop header
LB: loop body
LE: loop exit
PB: predicated region body
PF: predicated region fallthrough
CT: control target
= control target key end

     0   :  { %s1071_s12 = smov 0   ;;  %s1346_s0 = inlined_call_operand.vmem [shape: bf16[512,16], index: 0, kind: input, shape index: {}]   ;;  %s1347_s1 = inlined_call_operand.vmem [shape: bf16[16,128], index: 1, kind: input, shape index: {}]   ;;  %s1348_s2 = inlined_call_operand.vmem [shape: f32[1,128], index: 2, kind: input, shape index: {}]   ;;  %s1349_s3 = inlined_call_operand.vmem [shape: f32[512,128], index: 3, kind: output, shape index: {}]  }
   0x1 LB: > { %s792_s13 = sadd.s32 4294967295, %s1049_s12   ;;  %p796_p0 = scmp.ge.s32.totalorder %s1049_s12, 1  ;;  %s1049_s12 = sphi %s1071_s12, %s13_s12  }
   0x2   : > { %p138_p1 = scmp.lt.s32.totalorder %s1049_s12, 3 }
   0x4   : > { %p139_p2 = pnand %p796_p0, %p138_p1 }
   0x5   : > { %v898_v0 = vld [vmem:[%s1347_s1] sm:$0xff] (!%p139_p2)   ;;  %s797_s16 = sshll.u32 (!%p139_p2), %s792_s13, 5  ;;  %vm302_vm0 = vcmask (!%p139_p2), 130048  }
   0x6   : > { %142 = sbr.rel (%p139_p2) target bundleno = 322 (0x142), region = 32  ;;  %p163_p3 = scmp.lt.s32.totalorder (!%p139_p2), %s797_s16, 63  ;;  %854 = vmatprep.subr.bf16.mxu0 (!%p139_p2), %v898_v0  ;;  %888 = vmatprep.subr.bf16.mxu1 (!%p139_p2), %v898_v0  ;;  %v1125_v17 = vld [vmem:[%s1348_s2] ss:$0 sm:$0xff] (!%p139_p2) }
   0x7   : > { %855 = vmatpush3.bf16.msra.mxu0 (!%p139_p2), %v898_v0  ;;  %889 = vmatpush3.bf16.msra.mxu1 (!%p139_p2), %v898_v0 }
   0xd   : > { %s1351_s16 = smov (!%p163_p3, %s797_s16), 63 }
   0xe   : > { %s798_s17 = sshll.u32 %s1351_s16, 2  ;;  %s800_s23 = sshll.u32 %s1351_s16, 3 }
   0xf   : > { %s1088_s20 = scalar_lea.vmem %s1346_s0, %s798_s17  ;;  %s1227_s26 = scalar_lea.vmem %s1349_s3, %s800_s23 }
  0x10   : > { %v899_v1 = vld [vmem:[%s1088_s20] sm:$0xff]   ;;  %v901_v3 = vld [vmem:[%s1088_s20 + $0x8] sm:$0xff]   ;;  %v903_v5 = vld [vmem:[%s1088_s20 + $0x10] sm:$0xff]  }
  0x11   : > { %v900_v2 = vld [vmem:[%s1088_s20 + $0x40] sm:$0xff]   ;;  %856 = vmatprep.mubr.msk.bf16.mxu0 %vm302_vm0, %v899_v1  ;;  %v902_v4 = vld [vmem:[%s1088_s20 + $0x48] sm:$0xff]   ;;  %v904_v6 = vld [vmem:[%s1088_s20 + $0x50] sm:$0xff]  }
  0x12   : > { %872 = vmatprep.mubr.msk.bf16.mxu1 %vm302_vm0, %v900_v2  ;;  %857 = vmatmul.mubr.msk.bf16.vlgmr.msra.gmra.mrb[0].mxu0 %vm302_vm0, %v901_v3  ;;  %v905_v7 = vld [vmem:[%s1088_s20 + $0x18] sm:$0xff]   ;;  %v907_v9 = vld [vmem:[%s1088_s20 + $0x20] sm:$0xff]   ;;  %v909_v11 = vld [vmem:[%s1088_s20 + $0x28] sm:$0xff]  }
  0x13   : > { %873 = vmatmul.mubr.msk.bf16.vlgmr.msra.gmra.mrb[0].mxu1 %vm302_vm0, %v902_v4  ;;  %860 = vmatprep.mubr.msk.bf16.mxu0 %vm302_vm0, %v903_v5  ;;  %v906_v8 = vld [vmem:[%s1088_s20 + $0x58] sm:$0xff]   ;;  %v908_v10 = vld [vmem:[%s1088_s20 + $0x60] sm:$0xff]   ;;  %v910_v12 = vld [vmem:[%s1088_s20 + $0x68] sm:$0xff]  }
  0x14   : > { %876 = vmatprep.mubr.msk.bf16.mxu1 %vm302_vm0, %v904_v6  ;;  %v911_v13 = vld [vmem:[%s1088_s20 + $0x30] sm:$0xff]   ;;  %v913_v15 = vld [vmem:[%s1088_s20 + $0x38] sm:$0xff]  }
  0x15   : > { %v912_v14 = vld [vmem:[%s1088_s20 + $0x70] sm:$0xff]   ;;  %v914_v16 = vld [vmem:[%s1088_s20 + $0x78] sm:$0xff]  }
  0x1a   : > { %861 = vmatmul.mubr.msk.bf16.gmra.mrb[4].mxu0 %vm302_vm0, %v905_v7 }
  0x1b   : > { %877 = vmatmul.mubr.msk.bf16.gmra.mrb[4].mxu1 %vm302_vm0, %v906_v8  ;;  %864 = vmatprep.mubr.msk.bf16.mxu0 %vm302_vm0, %v907_v9 }
  0x1c   : > { %880 = vmatprep.mubr.msk.bf16.mxu1 %vm302_vm0, %v908_v10 }
  0x22   : > { %865 = vmatmul.mubr.msk.bf16.gmra.mrb[8].mxu0 %vm302_vm0, %v909_v11 }
  0x23   : > { %881 = vmatmul.mubr.msk.bf16.gmra.mrb[8].mxu1 %vm302_vm0, %v910_v12  ;;  %868 = vmatprep.mubr.msk.bf16.mxu0 %vm302_vm0, %v911_v13 }
  0x24   : > { %884 = vmatprep.mubr.msk.bf16.mxu1 %vm302_vm0, %v912_v14 }
  0x2a   : > { %869 = vmatmul.mubr.msk.bf16.gmra.mrb[12].mxu0 %vm302_vm0, %v913_v15 }
  0x2b   : > { %885 = vmatmul.mubr.msk.bf16.gmra.mrb[12].mxu1 %vm302_vm0, %v914_v16 }
  0xe5   : > { %v858_v18 = vpop.f32.mrb[0].mxu0 }
  0xe6   : > { %v1128_v19 = vadd.f32 %v858_v18, %v1125_v17  ;;  %v874_v20 = vpop.f32.mrb[0].mxu1  ;;  %v385_v21 = vpop.f32.mrb[1].mxu0 }
  0xe7   : > { %v1131_v22 = vadd.f32 %v874_v20, %v1125_v17  ;;  %v1134_v23 = vadd.f32 %v1125_v17, %v385_v21  ;;  %v449_v24 = vpop.f32.mrb[1].mxu1  ;;  %v859_v25 = vpop.f32.mrb[2].mxu0 }
  0xe8   : > { %v514_v26 = vsub.f32 0.0, %v1128_v19  ;;  %v1138_v27 = vadd.f32 %v1125_v17, %v449_v24  ;;  %v1141_v28 = vadd.f32 %v859_v25, %v1125_v17  ;;  %v875_v29 = vpop.f32.mrb[2].mxu1  ;;  %v388_v30 = vpop.f32.mrb[3].mxu0 }
  0xe9   : > { %v530_v31 = vsub.f32 0.0, %v1131_v22  ;;  %v512_v32 = vsub.f32 0.0, %v1134_v23  ;;  %v1146_v33 = vadd.f32 %v875_v29, %v1125_v17  ;;  %v1149_v34 = vadd.f32 %v1125_v17, %v388_v30  ;;  %v452_v35 = vpop.f32.mrb[3].mxu1 }
  0xea   : > { %v548_v36 = vmul.f32 1.442695, %v514_v26  ;;  %v528_v37 = vsub.f32 0.0, %v1138_v27  ;;  %v515_v38 = vsub.f32 0.0, %v1141_v28  ;;  %v1154_v39 = vadd.f32 %v1125_v17, %v452_v35 }
  0xeb   : > { %v580_v40 = vmul.f32 1.442695, %v530_v31  ;;  %v544_v41 = vmul.f32 1.442695, %v512_v32  ;;  %v531_v42 = vsub.f32 0.0, %v1146_v33  ;;  %v513_v43 = vsub.f32 0.0, %v1149_v34 }
  0xec   : > { %915 = vpow2.f32 %v548_v36  ;;  %v576_v44 = vmul.f32 1.442695, %v528_v37  ;;  %v550_v45 = vmul.f32 1.442695, %v515_v38  ;;  %v529_v46 = vsub.f32 0.0, %v1154_v39 }
  0xed   : > { %917 = vpow2.f32 %v580_v40  ;;  %v582_v47 = vmul.f32 1.442695, %v531_v42  ;;  %v862_v48 = vpop.f32.mrb[4].mxu0  ;;  %v546_v49 = vmul.f32 1.442695, %v513_v43 }
  0xee   : > { %919 = vpow2.f32 %v544_v41  ;;  %v1160_v50 = vadd.f32 %v862_v48, %v1125_v17  ;;  %v878_v51 = vpop.f32.mrb[4].mxu1  ;;  %v401_v52 = vpop.f32.mrb[5].mxu0  ;;  %v578_v53 = vmul.f32 1.442695, %v529_v46 }
  0xef   : > { %921 = vpow2.f32 %v576_v44  ;;  %v1163_v54 = vadd.f32 %v878_v51, %v1125_v17  ;;  %v1166_v55 = vadd.f32 %v1125_v17, %v401_v52  ;;  %v465_v56 = vpop.f32.mrb[5].mxu1  ;;  %v863_v57 = vpop.f32.mrb[6].mxu0 }
  0xf0   : > { %923 = vpow2.f32 %v550_v45  ;;  %v518_v58 = vsub.f32 0.0, %v1160_v50  ;;  %v1170_v59 = vadd.f32 %v1125_v17, %v465_v56  ;;  %v1173_v60 = vadd.f32 %v863_v57, %v1125_v17  ;;  %v879_v61 = vpop.f32.mrb[6].mxu1  ;;  %v404_v62 = vpop.f32.mrb[7].mxu0 }
  0xf1   : > { %925 = vpow2.f32 %v582_v47  ;;  %v534_v63 = vsub.f32 0.0, %v1163_v54  ;;  %v516_v0 = vsub.f32 0.0, %v1166_v55  ;;  %v468_v1 = vpop.f32.mrb[7].mxu1  ;;  %v1180_v11 = vadd.f32 %v879_v61, %v1125_v17 }
  0xf2   : > { %927 = vpow2.f32 %v546_v49  ;;  %v556_v2 = vmul.f32 1.442695, %v518_v58  ;;  %v532_v3 = vsub.f32 0.0, %v1170_v59  ;;  %v519_v4 = vsub.f32 0.0, %v1173_v60 }
  0xf3   : > { %929 = vpow2.f32 %v578_v53  ;;  %v588_v5 = vmul.f32 1.442695, %v534_v63  ;;  %v552_v6 = vmul.f32 1.442695, %v516_v0  ;;  %v1183_v16 = vadd.f32 %v1125_v17, %v404_v62 }
  0xf4   : > { %931 = vpow2.f32 %v556_v2  ;;  %v584_v7 = vmul.f32 1.442695, %v532_v3  ;;  %v558_v8 = vmul.f32 1.442695, %v519_v4  ;;  %v1186_v25 = vadd.f32 %v1125_v17, %v468_v1 }
  0xf5   : > { %933 = vpow2.f32 %v588_v5  ;;  %v866_v9 = vpop.f32.mrb[8].mxu0  ;;  %v535_v38 = vsub.f32 0.0, %v1180_v11  ;;  %v517_v43 = vsub.f32 0.0, %v1183_v16 }
  0xf6   : > { %v916_v10 = vpop.eup %915  ;;  %935 = vpow2.f32 %v552_v6  ;;  %v882_v12 = vpop.f32.mrb[8].mxu1  ;;  %v1189_v32 = vadd.f32 %v866_v9, %v1125_v17  ;;  %v533_v46 = vsub.f32 0.0, %v1186_v25 }
  0xf7   : > { %v417_v13 = vpop.f32.mrb[9].mxu0  ;;  %v918_v14 = vpop.eup %917  ;;  %v610_v15 = vadd.f32 1.0, %v916_v10  ;;  %937 = vpow2.f32 %v584_v7  ;;  %v1193_v40 = vadd.f32 %v882_v12, %v1125_v17  ;;  %v590_v56 = vmul.f32 1.442695, %v535_v38 }
  0xf8   : > { %v481_v18 = vpop.f32.mrb[9].mxu1  ;;  %v867_v20 = vpop.f32.mrb[10].mxu0  ;;  %v626_v24 = vadd.f32 1.0, %v918_v14  ;;  %939 = vpow2.f32 %v558_v8  ;;  %v522_v49 = vsub.f32 0.0, %v1189_v32  ;;  %v554_v0 = vmul.f32 1.442695, %v517_v43 }
  0xf9   : > { %v920_v21 = vpop.eup %919  ;;  %v883_v26 = vpop.f32.mrb[10].mxu1  ;;  %941 = vrcp.f32 %v610_v15  ;;  %v538_v57 = vsub.f32 0.0, %v1193_v40  ;;  %v1202_v1 = vadd.f32 %v1125_v17, %v417_v13  ;;  %v586_v6 = vmul.f32 1.442695, %v533_v46 }
  0xfa   : > { %v420_v29 = vpop.f32.mrb[11].mxu0  ;;  %v922_v30 = vpop.eup %921  ;;  %v608_v31 = vadd.f32 1.0, %v920_v21  ;;  %943 = vrcp.f32 %v626_v24  ;;  %v1210_v7 = vadd.f32 %v1125_v17, %v481_v18  ;;  %v564_v13 = vmul.f32 1.442695, %v522_v49 }
  0xfb   : > { %v484_v35 = vpop.f32.mrb[11].mxu1  ;;  %v924_v36 = vpop.eup %923  ;;  %v624_v37 = vadd.f32 1.0, %v922_v30  ;;  %v1217_v14 = vadd.f32 %v867_v20, %v1125_v17  ;;  %v596_v30 = vmul.f32 1.442695, %v538_v57  ;;  %v1222_v18 = vadd.f32 %v883_v26, %v1125_v17 }
  0xfc   : > { %v926_v41 = vpop.eup %925  ;;  %945 = vrcp.f32 %v608_v31  ;;  %v611_v42 = vadd.f32 1.0, %v924_v36  ;;  %v520_v20 = vsub.f32 0.0, %v1202_v1  ;;  %v536_v26 = vsub.f32 0.0, %v1210_v7 }
  0xfd   : > { %v928_v44 = vpop.eup %927  ;;  %947 = vrcp.f32 %v624_v37  ;;  %v627_v45 = vadd.f32 1.0, %v926_v41  ;;  %v870_v51 = vpop.f32.mrb[12].mxu0  ;;  %v1231_v37 = vadd.f32 %v1125_v17, %v420_v29 }
  0xfe   : > { %v930_v47 = vpop.eup %929  ;;  %949 = vrcp.f32 %v611_v42  ;;  %v609_v48 = vadd.f32 1.0, %v928_v44  ;;  %v886_v58 = vpop.f32.mrb[12].mxu1  ;;  %v1236_v42 = vadd.f32 %v1125_v17, %v484_v35  ;;  %v1241_v29 = vadd.f32 %v870_v51, %v1125_v17 }
  0xff   : > { %v932_v52 = vpop.eup %931  ;;  %951 = vrcp.f32 %v627_v45  ;;  %v625_v53 = vadd.f32 1.0, %v930_v47  ;;  %v1199_v61 = vpop.f32.mrb[13].mxu0  ;;  %v523_v45 = vsub.f32 0.0, %v1217_v14  ;;  %v539_v47 = vsub.f32 0.0, %v1222_v18 }
 0x100   : > { %v934_v62 = vpop.eup %933  ;;  %953 = vrcp.f32 %v609_v48  ;;  %v614_v63 = vadd.f32 1.0, %v932_v52  ;;  %v1204_v2 = vpop.f32.mrb[13].mxu1  ;;  %v1247_v35 = vadd.f32 %v886_v58, %v1125_v17  ;;  %v560_v49 = vmul.f32 1.442695, %v520_v20 }
 0x101   : > { %v1206_v3 = vpop.f32.mrb[14].mxu0  ;;  %v936_v4 = vpop.eup %935  ;;  %955 = vrcp.f32 %v625_v53  ;;  %v630_v5 = vadd.f32 1.0, %v934_v62  ;;  %v521_v51 = vsub.f32 0.0, %v1231_v37  ;;  %v592_v53 = vmul.f32 1.442695, %v536_v26 }
 0x102   : > { %v1212_v8 = vpop.f32.mrb[14].mxu1  ;;  %v1214_v9 = vpop.f32.mrb[15].mxu0  ;;  %957 = vrcp.f32 %v614_v63  ;;  %v612_v12 = vadd.f32 1.0, %v936_v4  ;;  %v526_v62 = vsub.f32 0.0, %v1241_v29  ;;  %v542_v4 = vsub.f32 0.0, %v1247_v35 }
 0x103   : > { %v938_v10 = vpop.eup %937  ;;  %v1219_v15 = vpop.f32.mrb[15].mxu1  ;;  %959 = vrcp.f32 %v630_v5 }
 0x104   : > { %v940_v21 = vpop.eup %939  ;;  %v628_v24 = vadd.f32 1.0, %v938_v10  ;;  %961 = vrcp.f32 %v612_v12 }
 0x105   : > { %v942_v31 = vpop.eup %941  ;;  %v615_v36 = vadd.f32 1.0, %v940_v21 }
 0x106   : > { %v944_v38 = vpop.eup %943  ;;  %v674_v41 = vmul.f32 %v942_v31, %v1128_v19  ;;  %963 = vrcp.f32 %v628_v24  ;;  %v572_v24 = vmul.f32 1.442695, %v526_v62  ;;  %v604_v31 = vmul.f32 1.442695, %v542_v4 }
 0x107   : > { %v946_v43 = vpop.eup %945  ;;  %v690_v44 = vmul.f32 %v944_v38, %v1131_v22  ;;  %965 = vrcp.f32 %v615_v36 }
 0x108   : > { %v948_v46 = vpop.eup %947  ;;  %706 = vst [vmem:[%s1227_s26 + $0x10] sm:$0xff] %v674_v41  ;;  %v672_v19 = vmul.f32 %v946_v43, %v1134_v23  ;;  %967 = vpow2.f32 %v590_v56  ;;  %v537_v56 = vsub.f32 0.0, %v1236_v42 }
 0x109   : > { %v950_v48 = vpop.eup %949  ;;  %722 = vst [vmem:[%s1227_s26 + $0x90] sm:$0xff] %v690_v44  ;;  %v688_v22 = vmul.f32 %v948_v46, %v1138_v27  ;;  %969 = vpow2.f32 %v554_v0  ;;  %v566_v27 = vmul.f32 1.442695, %v523_v45  ;;  %v1277_v46 = vadd.f32 %v1125_v17, %v1199_v61 }
 0x10a   : > { %v952_v52 = vpop.eup %951  ;;  %704 = vst [vmem:[%s1227_s26] sm:$0xff] %v672_v19  ;;  %v675_v23 = vmul.f32 %v950_v48, %v1141_v28  ;;  %971 = vpow2.f32 %v586_v6  ;;  %v598_v28 = vmul.f32 1.442695, %v539_v47  ;;  %v1281_v47 = vadd.f32 %v1125_v17, %v1204_v2 }
 0x10b   : > { %v954_v57 = vpop.eup %953  ;;  %720 = vst [vmem:[%s1227_s26 + $0x80] sm:$0xff] %v688_v22  ;;  %v691_v58 = vmul.f32 %v952_v52, %v1146_v33  ;;  %973 = vpow2.f32 %v564_v13  ;;  %v562_v33 = vmul.f32 1.442695, %v521_v51  ;;  %v594_v13 = vmul.f32 1.442695, %v537_v56 }
 0x10c   : > { %v956_v63 = vpop.eup %955  ;;  %707 = vst [vmem:[%s1227_s26 + $0x18] sm:$0xff] %v675_v23  ;;  %v673_v0 = vmul.f32 %v954_v57, %v1149_v34  ;;  %975 = vpow2.f32 %v596_v30  ;;  %v1289_v61 = vadd.f32 %v1212_v8, %v1125_v17  ;;  %v524_v2 = vsub.f32 0.0, %v1277_v46 }
 0x10d   : > { %v958_v5 = vpop.eup %957  ;;  %723 = vst [vmem:[%s1227_s26 + $0x98] sm:$0xff] %v691_v58  ;;  %v689_v6 = vmul.f32 %v956_v63, %v1154_v39  ;;  %977 = vpow2.f32 %v560_v49  ;;  %v1285_v49 = vadd.f32 %v1206_v3, %v1125_v17  ;;  %v1294_v56 = vadd.f32 %v1125_v17, %v1214_v9 }
 0x10e   : > { %v960_v10 = vpop.eup %959  ;;  %705 = vst [vmem:[%s1227_s26 + $0x8] sm:$0xff] %v673_v0  ;;  %v678_v12 = vmul.f32 %v958_v5, %v1160_v50  ;;  %979 = vpow2.f32 %v592_v53  ;;  %v540_v58 = vsub.f32 0.0, %v1281_v47  ;;  %v543_v9 = vsub.f32 0.0, %v1289_v61 }
 0x10f   : > { %v962_v34 = vpop.eup %961  ;;  %721 = vst [vmem:[%s1227_s26 + $0x88] sm:$0xff] %v689_v6  ;;  %v694_v21 = vmul.f32 %v960_v10, %v1163_v54  ;;  %981 = vpow2.f32 %v566_v27  ;;  %v1299_v27 = vadd.f32 %v1125_v17, %v1219_v15  ;;  %v527_v63 = vsub.f32 0.0, %v1285_v49 }
 0x110   : > { %v964_v30 = vpop.eup %963  ;;  %710 = vst [vmem:[%s1227_s26 + $0x30] sm:$0xff] %v678_v12  ;;  %v676_v39 = vmul.f32 %v962_v34, %v1166_v55  ;;  %983 = vpow2.f32 %v598_v28  ;;  %v568_v6 = vmul.f32 1.442695, %v524_v2  ;;  %v600_v15 = vmul.f32 1.442695, %v540_v58 }
 0x111   : > { %v966_v36 = vpop.eup %965  ;;  %726 = vst [vmem:[%s1227_s26 + $0xb0] sm:$0xff] %v694_v21  ;;  %v692_v50 = vmul.f32 %v964_v30, %v1170_v59  ;;  %985 = vpow2.f32 %v562_v33  ;;  %v525_v33 = vsub.f32 0.0, %v1294_v56  ;;  %v541_v12 = vsub.f32 0.0, %v1299_v27 }
 0x112   : > { %v968_v20 = vpop.eup %967  ;;  %708 = vst [vmem:[%s1227_s26 + $0x20] sm:$0xff] %v676_v39  ;;  %v679_v38 = vmul.f32 %v966_v36, %v1173_v60  ;;  %987 = vpow2.f32 %v594_v13  ;;  %v574_v21 = vmul.f32 1.442695, %v527_v63  ;;  %v606_v39 = vmul.f32 1.442695, %v543_v9 }
 0x113   : > { %v970_v54 = vpop.eup %969  ;;  %724 = vst [vmem:[%s1227_s26 + $0xa0] sm:$0xff] %v692_v50  ;;  %v631_v41 = vadd.f32 1.0, %v968_v20  ;;  %989 = vpow2.f32 %v572_v24  ;;  %v570_v50 = vmul.f32 1.442695, %v525_v33 }
 0x114   : > { %v972_v26 = vpop.eup %971  ;;  %711 = vst [vmem:[%s1227_s26 + $0x38] sm:$0xff] %v679_v38  ;;  %v613_v55 = vadd.f32 1.0, %v970_v54  ;;  %991 = vpow2.f32 %v604_v31  ;;  %v602_v38 = vmul.f32 1.442695, %v541_v12 }
 0x115   : > { %v974_v43 = vpop.eup %973  ;;  %993 = vrcp.f32 %v631_v41  ;;  %v629_v44 = vadd.f32 1.0, %v972_v26 }
 0x116   : > { %v976_v45 = vpop.eup %975  ;;  %995 = vrcp.f32 %v613_v55  ;;  %v618_v59 = vadd.f32 1.0, %v974_v43 }
 0x117   : > { %v978_v60 = vpop.eup %977  ;;  %997 = vrcp.f32 %v629_v44  ;;  %v634_v19 = vadd.f32 1.0, %v976_v45 }
 0x118   : > { %v980_v48 = vpop.eup %979  ;;  %999 = vrcp.f32 %v618_v59  ;;  %v616_v22 = vadd.f32 1.0, %v978_v60 }
 0x119   : > { %v982_v51 = vpop.eup %981  ;;  %1001 = vrcp.f32 %v634_v19  ;;  %v632_v52 = vadd.f32 1.0, %v980_v48 }
 0x11a   : > { %v984_v23 = vpop.eup %983  ;;  %1003 = vrcp.f32 %v616_v22  ;;  %v619_v53 = vadd.f32 1.0, %v982_v51 }
 0x11b   : > { %v986_v57 = vpop.eup %985  ;;  %1005 = vrcp.f32 %v632_v52  ;;  %v635_v3 = vadd.f32 1.0, %v984_v23 }
 0x11c   : > { %v988_v8 = vpop.eup %987  ;;  %1007 = vrcp.f32 %v619_v53  ;;  %v617_v62 = vadd.f32 1.0, %v986_v57 }
 0x11d   : > { %v990_v0 = vpop.eup %989  ;;  %1009 = vrcp.f32 %v635_v3  ;;  %v633_v28 = vadd.f32 1.0, %v988_v8 }
 0x11e   : > { %v992_v4 = vpop.eup %991  ;;  %1011 = vrcp.f32 %v617_v62  ;;  %v622_v5 = vadd.f32 1.0, %v990_v0 }
 0x11f   : > { %v994_v10 = vpop.eup %993  ;;  %1013 = vrcp.f32 %v633_v28  ;;  %v638_v17 = vadd.f32 1.0, %v992_v4 }
 0x120   : > { %v996_v13 = vpop.eup %995  ;;  %v695_v34 = vmul.f32 %v994_v10, %v1180_v11  ;;  %1015 = vrcp.f32 %v622_v5 }
 0x121   : > { %v998_v24 = vpop.eup %997  ;;  %v677_v30 = vmul.f32 %v996_v13, %v1183_v16  ;;  %1017 = vrcp.f32 %v638_v17 }
 0x122   : > { %v1000_v31 = vpop.eup %999  ;;  %727 = vst [vmem:[%s1227_s26 + $0xb8] sm:$0xff] %v695_v34  ;;  %v693_v36 = vmul.f32 %v998_v24, %v1186_v25  ;;  %1019 = vpow2.f32 %v568_v6 }
 0x123   : > { %v1002_v20 = vpop.eup %1001  ;;  %709 = vst [vmem:[%s1227_s26 + $0x28] sm:$0xff] %v677_v30  ;;  %v682_v11 = vmul.f32 %v1000_v31, %v1189_v32  ;;  %1021 = vpow2.f32 %v600_v15 }
 0x124   : > { %v1004_v54 = vpop.eup %1003  ;;  %725 = vst [vmem:[%s1227_s26 + $0xa8] sm:$0xff] %v693_v36  ;;  %v698_v16 = vmul.f32 %v1002_v20, %v1193_v40  ;;  %1023 = vpow2.f32 %v574_v21 }
 0x125   : > { %v1006_v41 = vpop.eup %1005  ;;  %714 = vst [vmem:[%s1227_s26 + $0x50] sm:$0xff] %v682_v11  ;;  %v680_v25 = vmul.f32 %v1004_v54, %v1202_v1  ;;  %1025 = vpow2.f32 %v606_v39 }
 0x126   : > { %v1008_v26 = vpop.eup %1007  ;;  %730 = vst [vmem:[%s1227_s26 + $0xd0] sm:$0xff] %v698_v16  ;;  %v696_v32 = vmul.f32 %v1006_v41, %v1210_v7  ;;  %1027 = vpow2.f32 %v570_v50 }
 0x127   : > { %v1010_v55 = vpop.eup %1009  ;;  %712 = vst [vmem:[%s1227_s26 + $0x40] sm:$0xff] %v680_v25  ;;  %v683_v43 = vmul.f32 %v1008_v26, %v1217_v14  ;;  %1029 = vpow2.f32 %v602_v38 }
 0x128   : > { %v1012_v40 = vpop.eup %1011  ;;  %728 = vst [vmem:[%s1227_s26 + $0xc0] sm:$0xff] %v696_v32  ;;  %v699_v44 = vmul.f32 %v1010_v55, %v1222_v18 }
 0x129   : > { %v1014_v1 = vpop.eup %1013  ;;  %715 = vst [vmem:[%s1227_s26 + $0x58] sm:$0xff] %v683_v43  ;;  %v681_v45 = vmul.f32 %v1012_v40, %v1231_v37 }
 0x12a   : > { %v1016_v59 = vpop.eup %1015  ;;  %731 = vst [vmem:[%s1227_s26 + $0xd8] sm:$0xff] %v699_v44  ;;  %v697_v7 = vmul.f32 %v1014_v1, %v1236_v42 }
 0x12b   : > { %v1018_v60 = vpop.eup %1017  ;;  %713 = vst [vmem:[%s1227_s26 + $0x48] sm:$0xff] %v681_v45  ;;  %v686_v19 = vmul.f32 %v1016_v59, %v1241_v29 }
 0x12c   : > { %v1020_v14 = vpop.eup %1019  ;;  %729 = vst [vmem:[%s1227_s26 + $0xc8] sm:$0xff] %v697_v7  ;;  %v702_v48 = vmul.f32 %v1018_v60, %v1247_v35 }
 0x12d   : > { %v1022_v22 = vpop.eup %1021  ;;  %718 = vst [vmem:[%s1227_s26 + $0x70] sm:$0xff] %v686_v19  ;;  %v620_v18 = vadd.f32 1.0, %v1020_v14 }
 0x12e   : > { %v1024_v51 = vpop.eup %1023  ;;  %734 = vst [vmem:[%s1227_s26 + $0xf0] sm:$0xff] %v702_v48  ;;  %v636_v52 = vadd.f32 1.0, %v1022_v22 }
 0x12f   : > { %v1026_v23 = vpop.eup %1025  ;;  %1031 = vrcp.f32 %v620_v18  ;;  %v623_v37 = vadd.f32 1.0, %v1024_v51 }
 0x130   : > { %v1028_v53 = vpop.eup %1027  ;;  %1033 = vrcp.f32 %v636_v52  ;;  %v639_v42 = vadd.f32 1.0, %v1026_v23 }
 0x131   : > { %v1030_v2 = vpop.eup %1029  ;;  %1035 = vrcp.f32 %v623_v37  ;;  %v621_v29 = vadd.f32 1.0, %v1028_v53 }
 0x132   : > { %1037 = vrcp.f32 %v639_v42  ;;  %v637_v35 = vadd.f32 1.0, %v1030_v2 }
 0x133   : > { %1039 = vrcp.f32 %v621_v29 }
 0x134   : > { %1041 = vrcp.f32 %v637_v35 }
 0x139   : > { %v1032_v57 = vpop.eup %1031 }
 0x13a   : > { %v1034_v3 = vpop.eup %1033  ;;  %v684_v58 = vmul.f32 %v1032_v57, %v1277_v46 }
 0x13b   : > { %v1036_v8 = vpop.eup %1035  ;;  %v700_v62 = vmul.f32 %v1034_v3, %v1281_v47 }
 0x13c   : > { %v1038_v63 = vpop.eup %1037  ;;  %716 = vst [vmem:[%s1227_s26 + $0x60] sm:$0xff] %v684_v58  ;;  %v687_v0 = vmul.f32 %v1036_v8, %v1285_v49 }
 0x13d   : > { %v1040_v28 = vpop.eup %1039  ;;  %732 = vst [vmem:[%s1227_s26 + $0xe0] sm:$0xff] %v700_v62  ;;  %v703_v9 = vmul.f32 %v1038_v63, %v1289_v61 }
 0x13e   : > { %v1042_v4 = vpop.eup %1041  ;;  %719 = vst [vmem:[%s1227_s26 + $0x78] sm:$0xff] %v687_v0  ;;  %v685_v5 = vmul.f32 %v1040_v28, %v1294_v56 }
 0x13f   : > { %735 = vst [vmem:[%s1227_s26 + $0xf8] sm:$0xff] %v703_v9  ;;  %v701_v6 = vmul.f32 %v1042_v4, %v1299_v27 }
 0x140   : > { %717 = vst [vmem:[%s1227_s26 + $0x68] sm:$0xff] %v685_v5 }
 0x141   : > { %733 = vst [vmem:[%s1227_s26 + $0xe8] sm:$0xff] %v701_v6 }
 0x142 PF: > { %s13_s12 = sadd.s32 1, %s1049_s12  }
 0x143   : > { %p10_p4 = scmp.ge.s32.totalorder %s13_s12, 4  }
 0x145   :  { %12 = sbr.rel (!%p10_p4) target bundleno = 1 (0x1), region = 62 }

// kernel: c2f_bottleneck_att_forward.7
= control target key start
LH: loop header
LB: loop body
LE: loop exit
PB: predicated region body
PF: predicated region fallthrough
CT: control target
= control target key end

     0   :  { %s1133_s12 = smov 0   ;;  %s1423_s0 = inlined_call_operand.vmem [shape: bf16[512,72], index: 0, kind: input, shape index: {}]   ;;  %s1424_s1 = inlined_call_operand.vmem [shape: bf16[72,128], index: 1, kind: input, shape index: {}]   ;;  %s1425_s2 = inlined_call_operand.vmem [shape: f32[1,128], index: 2, kind: input, shape index: {}]   ;;  %s1426_s3 = inlined_call_operand.vmem [shape: f32[512,128], index: 3, kind: output, shape index: {}]  }
   0x1 LB: > { %s824_s13 = sadd.s32 4294967295, %s1111_s12   ;;  %p828_p0 = scmp.ge.s32.totalorder %s1111_s12, 1  ;;  %s1111_s12 = sphi %s1133_s12, %s13_s12  }
   0x2   : > { %p138_p1 = scmp.lt.s32.totalorder %s1111_s12, 3 }
   0x4   : > { %p139_p2 = pnand %p828_p0, %p138_p1 }
   0x5   : > { %v956_v0 = vld [vmem:[%s1424_s1] sm:$0xff] (!%p139_p2)   ;;  %v957_v1 = vld [vmem:[%s1424_s1 + $0x8] sm:$0xff] (!%p139_p2)   ;;  %s829_s18 = sshll.u32 (!%p139_p2), %s824_s13, 5  ;;  %v958_v2 = vld [vmem:[%s1424_s1 + $0x10] sm:$0xff] (!%p139_p2)   ;;  %vm330_vm0 = vcmask (!%p139_p2), 588800   ;;  %vm379_vm1 = vcmask (!%p139_p2), 1043456  }
   0x6   : > { %142 = sbr.rel (%p139_p2) target bundleno = 330 (0x14a), region = 32  ;;  %894 = vmatprep.subr.bf16.mxu0 (!%p139_p2), %v956_v0  ;;  %936 = vmatprep.subr.bf16.mxu1 (!%p139_p2), %v956_v0  ;;  %p163_p3 = scmp.lt.s32.totalorder (!%p139_p2), %s829_s18, 63  ;;  %v959_v3 = vld [vmem:[%s1424_s1 + $0x18] sm:$0xff] (!%p139_p2)   ;;  %v960_v6 = vld [vmem:[%s1424_s1 + $0x20] ss:$0 sps:$4 sm:$0xff] (!%p139_p2)  }
   0x7   : > { %895 = vmatpush3.bf16.msra.mxu0 (!%p139_p2), %v956_v0  ;;  %941 = vmatpush3.bf16.msra.mxu1 (!%p139_p2), %v956_v0  ;;  %v381_v7 = vsel (!%p139_p2), %vm379_vm1, %v960_v6, 0  ;;  %v1199_v22 = vld [vmem:[%s1425_s2] ss:$0 sm:$0xff] (!%p139_p2) }
   0x8   : > { %896 = vmatprep.subr.bf16.mxu0 (!%p139_p2), %v957_v1  ;;  %937 = vmatprep.subr.bf16.mxu1 (!%p139_p2), %v957_v1 }
   0xb   : > { %897 = vmatpush3.bf16.msra.mxu0 (!%p139_p2), %v957_v1  ;;  %942 = vmatpush3.bf16.msra.mxu1 (!%p139_p2), %v957_v1 }
   0xc   : > { %898 = vmatprep.subr.bf16.mxu0 (!%p139_p2), %v958_v2  ;;  %938 = vmatprep.subr.bf16.mxu1 (!%p139_p2), %v958_v2 }
   0xd   : > { %s1428_s18 = smov (!%p163_p3, %s829_s18), 63 }
   0xe   : > { %s830_s21 = sshll.u32 %s1428_s18, 2  ;;  %s832_s4 = sshll.u32 %s1428_s18, 3 }
   0xf   : > { %s1159_s26 = scalar_lea.vmem %s1423_s0, %s830_s21  ;;  %899 = vmatpush3.bf16.msra.mxu0 %v958_v2  ;;  %943 = vmatpush3.bf16.msra.mxu1 %v958_v2  ;;  %s1304_s7 = scalar_lea.vmem %s1426_s3, %s832_s4 }
  0x10   : > { %v961_v4 = vld [vmem:[%s1159_s26] sm:$0xff]   ;;  %900 = vmatprep.subr.bf16.mxu0 %v959_v3  ;;  %939 = vmatprep.subr.bf16.mxu1 %v959_v3  ;;  %v963_v8 = vld [vmem:[%s1159_s26 + $0x8] sm:$0xff]   ;;  %v965_v10 = vld [vmem:[%s1159_s26 + $0x10] sm:$0xff]  }
  0x11   : > { %v962_v5 = vld [vmem:[%s1159_s26 + $0x40] sm:$0xff]   ;;  %904 = vmatprep.mubr.msk.bf16.mxu0 %vm330_vm0, %v961_v4  ;;  %v964_v9 = vld [vmem:[%s1159_s26 + $0x48] sm:$0xff]   ;;  %v966_v11 = vld [vmem:[%s1159_s26 + $0x50] sm:$0xff]  }
  0x12   : > { %920 = vmatprep.mubr.msk.bf16.mxu1 %vm330_vm0, %v962_v5  ;;  %v967_v12 = vld [vmem:[%s1159_s26 + $0x18] sm:$0xff]   ;;  %v969_v14 = vld [vmem:[%s1159_s26 + $0x20] sm:$0xff]   ;;  %v971_v16 = vld [vmem:[%s1159_s26 + $0x28] sm:$0xff]  }
  0x13   : > { %901 = vmatpush3.bf16.msra.mxu0 %v959_v3  ;;  %944 = vmatpush3.bf16.msra.mxu1 %v959_v3  ;;  %v968_v13 = vld [vmem:[%s1159_s26 + $0x58] sm:$0xff]   ;;  %v970_v15 = vld [vmem:[%s1159_s26 + $0x60] sm:$0xff]   ;;  %v972_v17 = vld [vmem:[%s1159_s26 + $0x68] sm:$0xff]  }
  0x14   : > { %946 = vmatprep.subr.msk.bf16.mxu0 %vm379_vm1, %v960_v6  ;;  %947 = vmatprep.subr.msk.bf16.mxu1 %vm379_vm1, %v960_v6  ;;  %v973_v18 = vld [vmem:[%s1159_s26 + $0x30] sm:$0xff]   ;;  %v975_v20 = vld [vmem:[%s1159_s26 + $0x38] sm:$0xff]  }
  0x15   : > { %v974_v19 = vld [vmem:[%s1159_s26 + $0x70] sm:$0xff]   ;;  %v976_v21 = vld [vmem:[%s1159_s26 + $0x78] sm:$0xff]  }
  0x17   : > { %903 = vmatpush3.bf16.msra.mxu0 %v381_v7  ;;  %945 = vmatpush3.bf16.msra.mxu1 %v381_v7 }
  0x1a   : > { %905 = vmatmul.mubr.msk.bf16.vlgmr.msra.gmra.mrb[0].mxu0 %vm330_vm0, %v963_v8  ;;  %921 = vmatmul.mubr.msk.bf16.vlgmr.msra.gmra.mrb[0].mxu1 %vm330_vm0, %v964_v9 }
  0x1b   : > { %908 = vmatprep.mubr.msk.bf16.mxu0 %vm330_vm0, %v965_v10  ;;  %924 = vmatprep.mubr.msk.bf16.mxu1 %vm330_vm0, %v966_v11 }
  0x22   : > { %909 = vmatmul.mubr.msk.bf16.gmra.mrb[4].mxu0 %vm330_vm0, %v967_v12  ;;  %925 = vmatmul.mubr.msk.bf16.gmra.mrb[4].mxu1 %vm330_vm0, %v968_v13 }
  0x23   : > { %912 = vmatprep.mubr.msk.bf16.mxu0 %vm330_vm0, %v969_v14  ;;  %928 = vmatprep.mubr.msk.bf16.mxu1 %vm330_vm0, %v970_v15 }
  0x2a   : > { %913 = vmatmul.mubr.msk.bf16.gmra.mrb[8].mxu0 %vm330_vm0, %v971_v16  ;;  %929 = vmatmul.mubr.msk.bf16.gmra.mrb[8].mxu1 %vm330_vm0, %v972_v17 }
  0x2b   : > { %916 = vmatprep.mubr.msk.bf16.mxu0 %vm330_vm0, %v973_v18  ;;  %932 = vmatprep.mubr.msk.bf16.mxu1 %vm330_vm0, %v974_v19 }
  0x32   : > { %917 = vmatmul.mubr.msk.bf16.gmra.mrb[12].mxu0 %vm330_vm0, %v975_v20  ;;  %933 = vmatmul.mubr.msk.bf16.gmra.mrb[12].mxu1 %vm330_vm0, %v976_v21 }
  0xed   : > { %v906_v23 = vpop.f32.mrb[0].mxu0  ;;  %v922_v24 = vpop.f32.mrb[0].mxu1 }
  0xee   : > { %v1202_v25 = vadd.f32 %v906_v23, %v1199_v22  ;;  %v1205_v26 = vadd.f32 %v922_v24, %v1199_v22  ;;  %v417_v27 = vpop.f32.mrb[1].mxu0  ;;  %v481_v28 = vpop.f32.mrb[1].mxu1 }
  0xef   : > { %v1208_v29 = vadd.f32 %v1199_v22, %v417_v27  ;;  %v1211_v30 = vadd.f32 %v1199_v22, %v481_v28  ;;  %v907_v31 = vpop.f32.mrb[2].mxu0  ;;  %v923_v32 = vpop.f32.mrb[2].mxu1 }
  0xf0   : > { %v546_v33 = vsub.f32 0.0, %v1202_v25  ;;  %v562_v34 = vsub.f32 0.0, %v1205_v26  ;;  %v1216_v35 = vadd.f32 %v907_v31, %v1199_v22  ;;  %v1219_v36 = vadd.f32 %v923_v32, %v1199_v22  ;;  %v420_v37 = vpop.f32.mrb[3].mxu0  ;;  %v484_v38 = vpop.f32.mrb[3].mxu1 }
  0xf1   : > { %v544_v39 = vsub.f32 0.0, %v1208_v29  ;;  %v560_v40 = vsub.f32 0.0, %v1211_v30  ;;  %v1224_v41 = vadd.f32 %v1199_v22, %v420_v37  ;;  %v1227_v42 = vadd.f32 %v1199_v22, %v484_v38 }
  0xf2   : > { %v580_v43 = vmul.f32 1.442695, %v546_v33  ;;  %v612_v44 = vmul.f32 1.442695, %v562_v34  ;;  %v547_v45 = vsub.f32 0.0, %v1216_v35  ;;  %v563_v46 = vsub.f32 0.0, %v1219_v36 }
  0xf3   : > { %v576_v47 = vmul.f32 1.442695, %v544_v39  ;;  %v608_v48 = vmul.f32 1.442695, %v560_v40  ;;  %v545_v49 = vsub.f32 0.0, %v1224_v41  ;;  %v561_v50 = vsub.f32 0.0, %v1227_v42 }
  0xf4   : > { %977 = vpow2.f32 %v580_v43  ;;  %v582_v51 = vmul.f32 1.442695, %v547_v45  ;;  %v614_v52 = vmul.f32 1.442695, %v563_v46 }
  0xf5   : > { %979 = vpow2.f32 %v612_v44  ;;  %v910_v53 = vpop.f32.mrb[4].mxu0  ;;  %v926_v54 = vpop.f32.mrb[4].mxu1  ;;  %v578_v55 = vmul.f32 1.442695, %v545_v49  ;;  %v610_v60 = vmul.f32 1.442695, %v561_v50 }
  0xf6   : > { %981 = vpow2.f32 %v576_v47  ;;  %v1234_v56 = vadd.f32 %v910_v53, %v1199_v22  ;;  %v1237_v57 = vadd.f32 %v926_v54, %v1199_v22  ;;  %v433_v58 = vpop.f32.mrb[5].mxu0  ;;  %v497_v59 = vpop.f32.mrb[5].mxu1 }
  0xf7   : > { %983 = vpow2.f32 %v608_v48  ;;  %v1240_v61 = vadd.f32 %v1199_v22, %v433_v58  ;;  %v1243_v62 = vadd.f32 %v1199_v22, %v497_v59  ;;  %v911_v63 = vpop.f32.mrb[6].mxu0  ;;  %v927_v0 = vpop.f32.mrb[6].mxu1 }
  0xf8   : > { %985 = vpow2.f32 %v582_v51  ;;  %v550_v1 = vsub.f32 0.0, %v1234_v56  ;;  %v566_v2 = vsub.f32 0.0, %v1237_v57  ;;  %v1248_v3 = vadd.f32 %v911_v63, %v1199_v22  ;;  %v436_v4 = vpop.f32.mrb[7].mxu0  ;;  %v500_v5 = vpop.f32.mrb[7].mxu1 }
  0xf9   : > { %987 = vpow2.f32 %v614_v52  ;;  %v548_v6 = vsub.f32 0.0, %v1240_v61  ;;  %v564_v7 = vsub.f32 0.0, %v1243_v62  ;;  %v1254_v17 = vadd.f32 %v927_v0, %v1199_v22 }
  0xfa   : > { %989 = vpow2.f32 %v578_v55  ;;  %v588_v8 = vmul.f32 1.442695, %v550_v1  ;;  %v620_v9 = vmul.f32 1.442695, %v566_v2  ;;  %v551_v10 = vsub.f32 0.0, %v1248_v3 }
  0xfb   : > { %991 = vpow2.f32 %v610_v60  ;;  %v584_v11 = vmul.f32 1.442695, %v548_v6  ;;  %v616_v12 = vmul.f32 1.442695, %v564_v7  ;;  %v1257_v23 = vadd.f32 %v1199_v22, %v436_v4 }
  0xfc   : > { %993 = vpow2.f32 %v588_v8  ;;  %v590_v13 = vmul.f32 1.442695, %v551_v10  ;;  %v1260_v32 = vadd.f32 %v1199_v22, %v500_v5  ;;  %v567_v43 = vsub.f32 0.0, %v1254_v17 }
  0xfd   : > { %995 = vpow2.f32 %v620_v9  ;;  %v914_v14 = vpop.f32.mrb[8].mxu0  ;;  %v930_v15 = vpop.f32.mrb[8].mxu1  ;;  %v549_v47 = vsub.f32 0.0, %v1257_v23 }
  0xfe   : > { %v978_v16 = vpop.eup %977  ;;  %997 = vpow2.f32 %v584_v11  ;;  %v449_v18 = vpop.f32.mrb[9].mxu0  ;;  %v1266_v44 = vadd.f32 %v914_v14, %v1199_v22  ;;  %v1270_v48 = vadd.f32 %v930_v15, %v1199_v22  ;;  %v565_v51 = vsub.f32 0.0, %v1260_v32 }
  0xff   : > { %v513_v19 = vpop.f32.mrb[9].mxu1  ;;  %v980_v20 = vpop.eup %979  ;;  %v642_v21 = vadd.f32 1.0, %v978_v16  ;;  %999 = vpow2.f32 %v616_v12  ;;  %v1274_v54 = vadd.f32 %v1199_v22, %v449_v18  ;;  %v622_v63 = vmul.f32 1.442695, %v567_v43 }
 0x100   : > { %v915_v24 = vpop.f32.mrb[10].mxu0  ;;  %v931_v27 = vpop.f32.mrb[10].mxu1  ;;  %v658_v31 = vadd.f32 1.0, %v980_v20  ;;  %1001 = vpow2.f32 %v590_v13  ;;  %v554_v0 = vsub.f32 0.0, %v1266_v44  ;;  %v586_v6 = vmul.f32 1.442695, %v549_v47 }
 0x101   : > { %v982_v28 = vpop.eup %981  ;;  %v452_v33 = vpop.f32.mrb[11].mxu0  ;;  %1003 = vrcp.f32 %v642_v21  ;;  %v570_v7 = vsub.f32 0.0, %v1270_v48  ;;  %v618_v12 = vmul.f32 1.442695, %v565_v51  ;;  %v1288_v13 = vadd.f32 %v1199_v22, %v513_v19 }
 0x102   : > { %v984_v34 = vpop.eup %983  ;;  %v640_v37 = vadd.f32 1.0, %v982_v28  ;;  %v1262_v38 = vpop.f32.mrb[11].mxu1  ;;  %1005 = vrcp.f32 %v658_v31  ;;  %v552_v20 = vsub.f32 0.0, %v1274_v54  ;;  %v1296_v21 = vadd.f32 %v915_v24, %v1199_v22 }
 0x103   : > { %v986_v39 = vpop.eup %985  ;;  %v656_v40 = vadd.f32 1.0, %v984_v34  ;;  %v596_v34 = vmul.f32 1.442695, %v554_v0  ;;  %v1307_v24 = vadd.f32 %v1199_v22, %v452_v33 }
 0x104   : > { %v988_v45 = vpop.eup %987  ;;  %1007 = vrcp.f32 %v640_v37  ;;  %v643_v46 = vadd.f32 1.0, %v986_v39  ;;  %v1299_v37 = vadd.f32 %v931_v27, %v1199_v22  ;;  %v568_v27 = vsub.f32 0.0, %v1288_v13 }
 0x105   : > { %v990_v49 = vpop.eup %989  ;;  %1009 = vrcp.f32 %v656_v40  ;;  %v659_v50 = vadd.f32 1.0, %v988_v45  ;;  %v918_v55 = vpop.f32.mrb[12].mxu0  ;;  %v628_v40 = vmul.f32 1.442695, %v570_v7 }
 0x106   : > { %v992_v52 = vpop.eup %991  ;;  %1011 = vrcp.f32 %v643_v46  ;;  %v641_v53 = vadd.f32 1.0, %v990_v49  ;;  %v934_v58 = vpop.f32.mrb[12].mxu1  ;;  %v1313_v46 = vadd.f32 %v1199_v22, %v1262_v38  ;;  %v1318_v33 = vadd.f32 %v918_v55, %v1199_v22 }
 0x107   : > { %v994_v59 = vpop.eup %993  ;;  %1013 = vrcp.f32 %v659_v50  ;;  %v657_v60 = vadd.f32 1.0, %v992_v52  ;;  %v1277_v1 = vpop.f32.mrb[13].mxu0  ;;  %v555_v50 = vsub.f32 0.0, %v1296_v21  ;;  %v571_v52 = vsub.f32 0.0, %v1299_v37 }
 0x108   : > { %v1279_v2 = vpop.f32.mrb[13].mxu1  ;;  %v996_v4 = vpop.eup %995  ;;  %1015 = vrcp.f32 %v641_v53  ;;  %v646_v5 = vadd.f32 1.0, %v994_v59  ;;  %v1324_v38 = vadd.f32 %v934_v58, %v1199_v22  ;;  %v592_v59 = vmul.f32 1.442695, %v552_v20 }
 0x109   : > { %v1282_v8 = vpop.f32.mrb[14].mxu0  ;;  %v1284_v9 = vpop.f32.mrb[14].mxu1  ;;  %1017 = vrcp.f32 %v657_v60  ;;  %v662_v11 = vadd.f32 1.0, %v996_v4  ;;  %v553_v55 = vsub.f32 0.0, %v1307_v24  ;;  %v569_v0 = vsub.f32 0.0, %v1313_v46 }
 0x10a   : > { %v998_v10 = vpop.eup %997  ;;  %v1290_v14 = vpop.f32.mrb[15].mxu0  ;;  %1019 = vrcp.f32 %v646_v5  ;;  %v558_v5 = vsub.f32 0.0, %v1318_v33 }
 0x10b   : > { %v1292_v15 = vpop.f32.mrb[15].mxu1  ;;  %v1000_v16 = vpop.eup %999  ;;  %v644_v18 = vadd.f32 1.0, %v998_v10  ;;  %1021 = vrcp.f32 %v662_v11  ;;  %v574_v10 = vsub.f32 0.0, %v1324_v38  ;;  %v626_v20 = vmul.f32 1.442695, %v569_v0 }
 0x10c   : > { %v1002_v28 = vpop.eup %1001  ;;  %v660_v31 = vadd.f32 1.0, %v1000_v16  ;;  %v1371_v0 = vadd.f32 %v1199_v22, %v1290_v14 }
 0x10d   : > { %v1004_v19 = vpop.eup %1003  ;;  %1023 = vrcp.f32 %v644_v18  ;;  %v647_v39 = vadd.f32 1.0, %v1002_v28 }
 0x10e   : > { %v1006_v43 = vpop.eup %1005  ;;  %v706_v45 = vmul.f32 %v1004_v19, %v1202_v25  ;;  %1025 = vrcp.f32 %v660_v31  ;;  %v604_v31 = vmul.f32 1.442695, %v558_v5  ;;  %v636_v19 = vmul.f32 1.442695, %v574_v10 }
 0x10f   : > { %v1008_v47 = vpop.eup %1007  ;;  %v722_v49 = vmul.f32 %v1006_v43, %v1205_v26  ;;  %1027 = vrcp.f32 %v647_v39 }
 0x110   : > { %v1010_v51 = vpop.eup %1009  ;;  %738 = vst [vmem:[%s1304_s7 + $0x10] sm:$0xff] %v706_v45  ;;  %v704_v25 = vmul.f32 %v1008_v47, %v1208_v29  ;;  %1029 = vpow2.f32 %v622_v63  ;;  %v624_v63 = vmul.f32 1.442695, %v568_v27 }
 0x111   : > { %v1012_v53 = vpop.eup %1011  ;;  %754 = vst [vmem:[%s1304_s7 + $0x90] sm:$0xff] %v722_v49  ;;  %v720_v26 = vmul.f32 %v1010_v51, %v1211_v30  ;;  %1031 = vpow2.f32 %v586_v6  ;;  %v598_v30 = vmul.f32 1.442695, %v555_v50  ;;  %v1354_v51 = vadd.f32 %v1199_v22, %v1277_v1 }
 0x112   : > { %v1014_v60 = vpop.eup %1013  ;;  %736 = vst [vmem:[%s1304_s7] sm:$0xff] %v704_v25  ;;  %v707_v29 = vmul.f32 %v1012_v53, %v1216_v35  ;;  %1033 = vpow2.f32 %v618_v12  ;;  %v630_v35 = vmul.f32 1.442695, %v571_v52  ;;  %v1358_v52 = vadd.f32 %v1199_v22, %v1279_v2 }
 0x113   : > { %v1016_v58 = vpop.eup %1015  ;;  %752 = vst [vmem:[%s1304_s7 + $0x80] sm:$0xff] %v720_v26  ;;  %v723_v4 = vmul.f32 %v1014_v60, %v1219_v36  ;;  %1035 = vpow2.f32 %v596_v34  ;;  %v594_v36 = vmul.f32 1.442695, %v553_v55  ;;  %v1366_v1 = vadd.f32 %v1284_v9, %v1199_v22 }
 0x114   : > { %v1018_v6 = vpop.eup %1017  ;;  %739 = vst [vmem:[%s1304_s7 + $0x18] sm:$0xff] %v707_v29  ;;  %v705_v7 = vmul.f32 %v1016_v58, %v1224_v41  ;;  %1037 = vpow2.f32 %v628_v40  ;;  %v556_v2 = vsub.f32 0.0, %v1354_v51 }
 0x115   : > { %v1020_v11 = vpop.eup %1019  ;;  %755 = vst [vmem:[%s1304_s7 + $0x98] sm:$0xff] %v723_v4  ;;  %v721_v12 = vmul.f32 %v1018_v6, %v1227_v42  ;;  %1039 = vpow2.f32 %v592_v59  ;;  %v1362_v59 = vadd.f32 %v1282_v8, %v1199_v22  ;;  %v572_v4 = vsub.f32 0.0, %v1358_v52 }
 0x116   : > { %v1022_v16 = vpop.eup %1021  ;;  %737 = vst [vmem:[%s1304_s7 + $0x8] sm:$0xff] %v705_v7  ;;  %v710_v18 = vmul.f32 %v1020_v11, %v1234_v56  ;;  %1041 = vpow2.f32 %v624_v63  ;;  %v575_v14 = vsub.f32 0.0, %v1366_v1 }
 0x117   : > { %v1024_v41 = vpop.eup %1023  ;;  %753 = vst [vmem:[%s1304_s7 + $0x88] sm:$0xff] %v721_v12  ;;  %v726_v28 = vmul.f32 %v1022_v16, %v1237_v57  ;;  %1043 = vpow2.f32 %v598_v30  ;;  %v1376_v30 = vadd.f32 %v1199_v22, %v1292_v15  ;;  %v559_v6 = vsub.f32 0.0, %v1362_v59 }
 0x118   : > { %v1026_v34 = vpop.eup %1025  ;;  %742 = vst [vmem:[%s1304_s7 + $0x30] sm:$0xff] %v710_v18  ;;  %v708_v42 = vmul.f32 %v1024_v41, %v1240_v61  ;;  %1045 = vpow2.f32 %v630_v35  ;;  %v600_v12 = vmul.f32 1.442695, %v556_v2  ;;  %v632_v15 = vmul.f32 1.442695, %v572_v4 }
 0x119   : > { %v1028_v39 = vpop.eup %1027  ;;  %758 = vst [vmem:[%s1304_s7 + $0xb0] sm:$0xff] %v726_v28  ;;  %v724_v56 = vmul.f32 %v1026_v34, %v1243_v62  ;;  %1047 = vpow2.f32 %v594_v36  ;;  %v557_v36 = vsub.f32 0.0, %v1371_v0  ;;  %v573_v18 = vsub.f32 0.0, %v1376_v30 }
 0x11a   : > { %v1030_v40 = vpop.eup %1029  ;;  %740 = vst [vmem:[%s1304_s7 + $0x20] sm:$0xff] %v708_v42  ;;  %v711_v43 = vmul.f32 %v1028_v39, %v1248_v3  ;;  %1049 = vpow2.f32 %v626_v20  ;;  %v606_v28 = vmul.f32 1.442695, %v559_v6  ;;  %v638_v42 = vmul.f32 1.442695, %v575_v14 }
 0x11b   : > { %v1032_v57 = vpop.eup %1031  ;;  %756 = vst [vmem:[%s1304_s7 + $0xa0] sm:$0xff] %v724_v56  ;;  %v663_v45 = vadd.f32 1.0, %v1030_v40  ;;  %1051 = vpow2.f32 %v604_v31  ;;  %v602_v56 = vmul.f32 1.442695, %v557_v36 }
 0x11c   : > { %v1034_v27 = vpop.eup %1033  ;;  %743 = vst [vmem:[%s1304_s7 + $0x38] sm:$0xff] %v711_v43  ;;  %v645_v61 = vadd.f32 1.0, %v1032_v57  ;;  %1053 = vpow2.f32 %v636_v19  ;;  %v634_v43 = vmul.f32 1.442695, %v573_v18 }
 0x11d   : > { %v1036_v47 = vpop.eup %1035  ;;  %1055 = vrcp.f32 %v663_v45  ;;  %v661_v49 = vadd.f32 1.0, %v1034_v27 }
 0x11e   : > { %v1038_v50 = vpop.eup %1037  ;;  %1057 = vrcp.f32 %v645_v61  ;;  %v650_v62 = vadd.f32 1.0, %v1036_v47 }
 0x11f   : > { %v1040_v3 = vpop.eup %1039  ;;  %1059 = vrcp.f32 %v661_v49  ;;  %v666_v25 = vadd.f32 1.0, %v1038_v50 }
 0x120   : > { %v1042_v53 = vpop.eup %1041  ;;  %1061 = vrcp.f32 %v650_v62  ;;  %v648_v26 = vadd.f32 1.0, %v1040_v3 }
 0x121   : > { %v1044_v55 = vpop.eup %1043  ;;  %1063 = vrcp.f32 %v666_v25  ;;  %v664_v60 = vadd.f32 1.0, %v1042_v53 }
 0x122   : > { %v1046_v29 = vpop.eup %1045  ;;  %1065 = vrcp.f32 %v648_v26  ;;  %v651_v63 = vadd.f32 1.0, %v1044_v55 }
 0x123   : > { %v1048_v58 = vpop.eup %1047  ;;  %1067 = vrcp.f32 %v664_v60  ;;  %v667_v8 = vadd.f32 1.0, %v1046_v29 }
 0x124   : > { %v1050_v9 = vpop.eup %1049  ;;  %1069 = vrcp.f32 %v651_v63  ;;  %v649_v5 = vadd.f32 1.0, %v1048_v58 }
 0x125   : > { %v1052_v7 = vpop.eup %1051  ;;  %1071 = vrcp.f32 %v667_v8  ;;  %v665_v35 = vadd.f32 1.0, %v1050_v9 }
 0x126   : > { %v1054_v10 = vpop.eup %1053  ;;  %1073 = vrcp.f32 %v649_v5  ;;  %v654_v11 = vadd.f32 1.0, %v1052_v7 }
 0x127   : > { %v1056_v16 = vpop.eup %1055  ;;  %1075 = vrcp.f32 %v665_v35  ;;  %v670_v22 = vadd.f32 1.0, %v1054_v10 }
 0x128   : > { %v1058_v20 = vpop.eup %1057  ;;  %v727_v41 = vmul.f32 %v1056_v16, %v1254_v17  ;;  %1077 = vrcp.f32 %v654_v11 }
 0x129   : > { %v1060_v31 = vpop.eup %1059  ;;  %v709_v34 = vmul.f32 %v1058_v20, %v1257_v23  ;;  %1079 = vrcp.f32 %v670_v22 }
 0x12a   : > { %v1062_v19 = vpop.eup %1061  ;;  %759 = vst [vmem:[%s1304_s7 + $0xb8] sm:$0xff] %v727_v41  ;;  %v725_v39 = vmul.f32 %v1060_v31, %v1260_v32  ;;  %1081 = vpow2.f32 %v600_v12 }
 0x12b   : > { %v1064_v40 = vpop.eup %1063  ;;  %741 = vst [vmem:[%s1304_s7 + $0x28] sm:$0xff] %v709_v34  ;;  %v714_v17 = vmul.f32 %v1062_v19, %v1266_v44  ;;  %1083 = vpow2.f32 %v632_v15 }
 0x12c   : > { %v1066_v57 = vpop.eup %1065  ;;  %757 = vst [vmem:[%s1304_s7 + $0xa8] sm:$0xff] %v725_v39  ;;  %v730_v23 = vmul.f32 %v1064_v40, %v1270_v48  ;;  %1085 = vpow2.f32 %v606_v28 }
 0x12d   : > { %v1068_v45 = vpop.eup %1067  ;;  %746 = vst [vmem:[%s1304_s7 + $0x50] sm:$0xff] %v714_v17  ;;  %v712_v32 = vmul.f32 %v1066_v57, %v1274_v54  ;;  %1087 = vpow2.f32 %v638_v42 }
 0x12e   : > { %v1070_v27 = vpop.eup %1069  ;;  %762 = vst [vmem:[%s1304_s7 + $0xd0] sm:$0xff] %v730_v23  ;;  %v728_v44 = vmul.f32 %v1068_v45, %v1288_v13  ;;  %1089 = vpow2.f32 %v602_v56 }
 0x12f   : > { %v1072_v61 = vpop.eup %1071  ;;  %744 = vst [vmem:[%s1304_s7 + $0x40] sm:$0xff] %v712_v32  ;;  %v715_v47 = vmul.f32 %v1070_v27, %v1296_v21  ;;  %1091 = vpow2.f32 %v634_v43 }
 0x130   : > { %v1074_v48 = vpop.eup %1073  ;;  %760 = vst [vmem:[%s1304_s7 + $0xc0] sm:$0xff] %v728_v44  ;;  %v731_v49 = vmul.f32 %v1072_v61, %v1299_v37 }
 0x131   : > { %v1076_v54 = vpop.eup %1075  ;;  %747 = vst [vmem:[%s1304_s7 + $0x58] sm:$0xff] %v715_v47  ;;  %v713_v50 = vmul.f32 %v1074_v48, %v1307_v24 }
 0x132   : > { %v1078_v62 = vpop.eup %1077  ;;  %763 = vst [vmem:[%s1304_s7 + $0xd8] sm:$0xff] %v731_v49  ;;  %v729_v13 = vmul.f32 %v1076_v54, %v1313_v46 }
 0x133   : > { %v1080_v3 = vpop.eup %1079  ;;  %745 = vst [vmem:[%s1304_s7 + $0x48] sm:$0xff] %v713_v50  ;;  %v718_v25 = vmul.f32 %v1078_v62, %v1318_v33 }
 0x134   : > { %v1082_v21 = vpop.eup %1081  ;;  %761 = vst [vmem:[%s1304_s7 + $0xc8] sm:$0xff] %v729_v13  ;;  %v734_v53 = vmul.f32 %v1080_v3, %v1324_v38 }
 0x135   : > { %v1084_v26 = vpop.eup %1083  ;;  %750 = vst [vmem:[%s1304_s7 + $0x70] sm:$0xff] %v718_v25  ;;  %v652_v37 = vadd.f32 1.0, %v1082_v21 }
 0x136   : > { %v1086_v55 = vpop.eup %1085  ;;  %766 = vst [vmem:[%s1304_s7 + $0xf0] sm:$0xff] %v734_v53  ;;  %v668_v60 = vadd.f32 1.0, %v1084_v26 }
 0x137   : > { %v1088_v29 = vpop.eup %1087  ;;  %1093 = vrcp.f32 %v652_v37  ;;  %v655_v24 = vadd.f32 1.0, %v1086_v55 }
 0x138   : > { %v1090_v63 = vpop.eup %1089  ;;  %1095 = vrcp.f32 %v668_v60  ;;  %v671_v46 = vadd.f32 1.0, %v1088_v29 }
 0x139   : > { %v1092_v2 = vpop.eup %1091  ;;  %1097 = vrcp.f32 %v655_v24  ;;  %v653_v33 = vadd.f32 1.0, %v1090_v63 }
 0x13a   : > { %1099 = vrcp.f32 %v671_v46  ;;  %v669_v38 = vadd.f32 1.0, %v1092_v2 }
 0x13b   : > { %1101 = vrcp.f32 %v653_v33 }
 0x13c   : > { %1103 = vrcp.f32 %v669_v38 }
 0x141   : > { %v1094_v58 = vpop.eup %1093 }
 0x142   : > { %v1096_v8 = vpop.eup %1095  ;;  %v716_v4 = vmul.f32 %v1094_v58, %v1354_v51 }
 0x143   : > { %v1098_v9 = vpop.eup %1097  ;;  %v732_v5 = vmul.f32 %v1096_v8, %v1358_v52 }
 0x144   : > { %v1100_v6 = vpop.eup %1099  ;;  %748 = vst [vmem:[%s1304_s7 + $0x60] sm:$0xff] %v716_v4  ;;  %v719_v7 = vmul.f32 %v1098_v9, %v1362_v59 }
 0x145   : > { %v1102_v35 = vpop.eup %1101  ;;  %764 = vst [vmem:[%s1304_s7 + $0xe0] sm:$0xff] %v732_v5  ;;  %v735_v14 = vmul.f32 %v1100_v6, %v1366_v1 }
 0x146   : > { %v1104_v10 = vpop.eup %1103  ;;  %751 = vst [vmem:[%s1304_s7 + $0x78] sm:$0xff] %v719_v7  ;;  %v717_v11 = vmul.f32 %v1102_v35, %v1371_v0 }
 0x147   : > { %767 = vst [vmem:[%s1304_s7 + $0xf8] sm:$0xff] %v735_v14  ;;  %v733_v12 = vmul.f32 %v1104_v10, %v1376_v30 }
 0x148   : > { %749 = vst [vmem:[%s1304_s7 + $0x68] sm:$0xff] %v717_v11 }
 0x149   : > { %765 = vst [vmem:[%s1304_s7 + $0xe8] sm:$0xff] %v733_v12 }
 0x14a PF: > { %s13_s12 = sadd.s32 1, %s1111_s12  }
 0x14b   : > { %p10_p4 = scmp.ge.s32.totalorder %s13_s12, 4  }
 0x14d   :  { %12 = sbr.rel (!%p10_p4) target bundleno = 1 (0x1), region = 62 }

// kernel: c2f_bottleneck_att_forward.9
= control target key start
LH: loop header
LB: loop body
LE: loop exit
PB: predicated region body
PF: predicated region fallthrough
CT: control target
= control target key end

     0   :  { %s748_s12 = smov 0   ;;  %s877_s0 = inlined_call_operand.vmem [shape: bf16[512,8], index: 0, kind: input, shape index: {}]   ;;  %s878_s1 = inlined_call_operand.vmem [shape: bf16[8,128], index: 1, kind: input, shape index: {}]   ;;  %s879_s2 = inlined_call_operand.vmem [shape: f32[1,128], index: 2, kind: input, shape index: {}]   ;;  %s880_s3 = inlined_call_operand.vmem [shape: f32[512,128], index: 3, kind: output, shape index: {}]  }
   0x1 LB: > { %s597_s13 = sadd.s32 4294967295, %s726_s12   ;;  %p601_p0 = scmp.ge.s32.totalorder %s726_s12, 1  ;;  %s726_s12 = sphi %s748_s12, %s13_s12  }
   0x2   : > { %p138_p1 = scmp.lt.s32.totalorder %s726_s12, 3 }
   0x4   : > { %p139_p2 = pnand %p601_p0, %p138_p1 }
   0x5   : > { %v207_v0 = vld [vmem:[%s878_s1] sm:$0xf] (!%p139_p2)  ;;  %vm344_vm0 = vcmask (!%p139_p2), 1043456   ;;  %s602_s16 = sshll.u32 (!%p139_p2), %s597_s13, 5  ;;  %vm295_vm1 = vcmask (!%p139_p2), 64512  }
   0x6   : > { %142 = sbr.rel (%p139_p2) target bundleno = 261 (0x105), region = 32  ;;  %694 = vmatprep.subr.msk.bf16.mxu0 (!%p139_p2), %vm344_vm0, %v207_v0  ;;  %695 = vmatprep.subr.msk.bf16.mxu1 (!%p139_p2), %vm344_vm0, %v207_v0  ;;  %v346_v1 = vsel (!%p139_p2), %vm344_vm0, %v207_v0, 0  ;;  %p163_p3 = scmp.lt.s32.totalorder (!%p139_p2), %s602_s16, 63  ;;  %v803_v18 = vld [vmem:[%s879_s2] ss:$0 sm:$0xff] (!%p139_p2) }
   0x7   : > { %659 = vmatpush3.bf16.msra.mxu0 (!%p139_p2), %v346_v1  ;;  %693 = vmatpush3.bf16.msra.mxu1 (!%p139_p2), %v346_v1 }
   0xd   : > { %s882_s16 = smov (!%p163_p3, %s602_s16), 63 }
   0xe   : > { %s603_s17 = sshll.u32 %s882_s16, 2  ;;  %s605_s21 = sshll.u32 %s882_s16, 3 }
   0xf   : > { %s765_s20 = scalar_lea.vmem %s877_s0, %s603_s17  ;;  %s808_s26 = scalar_lea.vmem %s880_s3, %s605_s21 }
  0x10   : > { %v704_v2 = vld [vmem:[%s765_s20] sm:$0xff]   ;;  %v706_v4 = vld [vmem:[%s765_s20 + $0x8] sm:$0xff]   ;;  %v708_v6 = vld [vmem:[%s765_s20 + $0x10] sm:$0xff]  }
  0x11   : > { %v705_v3 = vld [vmem:[%s765_s20 + $0x40] sm:$0xff]   ;;  %660 = vmatprep.mubr.msk.bf16.mxu0 %vm295_vm1, %v704_v2  ;;  %v707_v5 = vld [vmem:[%s765_s20 + $0x48] sm:$0xff]   ;;  %v709_v7 = vld [vmem:[%s765_s20 + $0x50] sm:$0xff]  }
  0x12   : > { %676 = vmatprep.mubr.msk.bf16.mxu1 %vm295_vm1, %v705_v3  ;;  %661 = vmatmul.mubr.msk.bf16.vlgmr.msra.gmra.mrb[0].mxu0 %vm295_vm1, %v706_v4  ;;  %v710_v8 = vld [vmem:[%s765_s20 + $0x18] sm:$0xff]   ;;  %v712_v10 = vld [vmem:[%s765_s20 + $0x20] sm:$0xff]   ;;  %v714_v12 = vld [vmem:[%s765_s20 + $0x28] sm:$0xff]  }
  0x13   : > { %677 = vmatmul.mubr.msk.bf16.vlgmr.msra.gmra.mrb[0].mxu1 %vm295_vm1, %v707_v5  ;;  %664 = vmatprep.mubr.msk.bf16.mxu0 %vm295_vm1, %v708_v6  ;;  %v711_v9 = vld [vmem:[%s765_s20 + $0x58] sm:$0xff]   ;;  %v713_v11 = vld [vmem:[%s765_s20 + $0x60] sm:$0xff]   ;;  %v715_v13 = vld [vmem:[%s765_s20 + $0x68] sm:$0xff]  }
  0x14   : > { %680 = vmatprep.mubr.msk.bf16.mxu1 %vm295_vm1, %v709_v7  ;;  %v716_v14 = vld [vmem:[%s765_s20 + $0x30] sm:$0xff]   ;;  %v718_v16 = vld [vmem:[%s765_s20 + $0x38] sm:$0xff]  }
  0x15   : > { %v717_v15 = vld [vmem:[%s765_s20 + $0x70] sm:$0xff]   ;;  %v719_v17 = vld [vmem:[%s765_s20 + $0x78] sm:$0xff]  }
  0x1a   : > { %665 = vmatmul.mubr.msk.bf16.gmra.mrb[4].mxu0 %vm295_vm1, %v710_v8 }
  0x1b   : > { %681 = vmatmul.mubr.msk.bf16.gmra.mrb[4].mxu1 %vm295_vm1, %v711_v9  ;;  %668 = vmatprep.mubr.msk.bf16.mxu0 %vm295_vm1, %v712_v10 }
  0x1c   : > { %684 = vmatprep.mubr.msk.bf16.mxu1 %vm295_vm1, %v713_v11 }
  0x22   : > { %669 = vmatmul.mubr.msk.bf16.gmra.mrb[8].mxu0 %vm295_vm1, %v714_v12 }
  0x23   : > { %685 = vmatmul.mubr.msk.bf16.gmra.mrb[8].mxu1 %vm295_vm1, %v715_v13  ;;  %672 = vmatprep.mubr.msk.bf16.mxu0 %vm295_vm1, %v716_v14 }
  0x24   : > { %688 = vmatprep.mubr.msk.bf16.mxu1 %vm295_vm1, %v717_v15 }
  0x2a   : > { %673 = vmatmul.mubr.msk.bf16.gmra.mrb[12].mxu0 %vm295_vm1, %v718_v16 }
  0x2b   : > { %689 = vmatmul.mubr.msk.bf16.gmra.mrb[12].mxu1 %vm295_vm1, %v719_v17 }
  0xe5   : > { %v662_v19 = vpop.f32.mrb[0].mxu0 }
  0xe6   : > { %v391_v20 = vadd.f32 %v662_v19, %v803_v18  ;;  %v678_v21 = vpop.f32.mrb[0].mxu1  ;;  %v382_v22 = vpop.f32.mrb[1].mxu0 }
  0xe7   : > { %v455_v23 = vadd.f32 %v678_v21, %v803_v18  ;;  %v383_v24 = vadd.f32 %v803_v18, %v382_v22  ;;  %v446_v25 = vpop.f32.mrb[1].mxu1  ;;  %v663_v26 = vpop.f32.mrb[2].mxu0 }
  0xe8   : > { %511 = vst [vmem:[%s808_s26 + $0x10] sm:$0xff] %v391_v20  ;;  %v447_v27 = vadd.f32 %v803_v18, %v446_v25  ;;  %v394_v28 = vadd.f32 %v663_v26, %v803_v18  ;;  %v679_v29 = vpop.f32.mrb[2].mxu1  ;;  %v385_v30 = vpop.f32.mrb[3].mxu0 }
  0xe9   : > { %527 = vst [vmem:[%s808_s26 + $0x90] sm:$0xff] %v455_v23  ;;  %509 = vst [vmem:[%s808_s26] sm:$0xff] %v383_v24  ;;  %v458_v31 = vadd.f32 %v679_v29, %v803_v18  ;;  %v386_v32 = vadd.f32 %v803_v18, %v385_v30  ;;  %v449_v33 = vpop.f32.mrb[3].mxu1 }
  0xea   : > { %525 = vst [vmem:[%s808_s26 + $0x80] sm:$0xff] %v447_v27  ;;  %512 = vst [vmem:[%s808_s26 + $0x18] sm:$0xff] %v394_v28  ;;  %v450_v34 = vadd.f32 %v803_v18, %v449_v33 }
  0xeb   : > { %528 = vst [vmem:[%s808_s26 + $0x98] sm:$0xff] %v458_v31  ;;  %510 = vst [vmem:[%s808_s26 + $0x8] sm:$0xff] %v386_v32 }
  0xec   : > { %526 = vst [vmem:[%s808_s26 + $0x88] sm:$0xff] %v450_v34 }
  0xed   : > { %v666_v35 = vpop.f32.mrb[4].mxu0 }
  0xee   : > { %v407_v36 = vadd.f32 %v666_v35, %v803_v18  ;;  %v682_v37 = vpop.f32.mrb[4].mxu1  ;;  %v398_v38 = vpop.f32.mrb[5].mxu0 }
  0xef   : > { %v471_v39 = vadd.f32 %v682_v37, %v803_v18  ;;  %v399_v40 = vadd.f32 %v803_v18, %v398_v38  ;;  %v462_v41 = vpop.f32.mrb[5].mxu1  ;;  %v667_v42 = vpop.f32.mrb[6].mxu0 }
  0xf0   : > { %515 = vst [vmem:[%s808_s26 + $0x30] sm:$0xff] %v407_v36  ;;  %v463_v43 = vadd.f32 %v803_v18, %v462_v41  ;;  %v410_v44 = vadd.f32 %v667_v42, %v803_v18  ;;  %v683_v45 = vpop.f32.mrb[6].mxu1  ;;  %v401_v46 = vpop.f32.mrb[7].mxu0 }
  0xf1   : > { %531 = vst [vmem:[%s808_s26 + $0xb0] sm:$0xff] %v471_v39  ;;  %513 = vst [vmem:[%s808_s26 + $0x20] sm:$0xff] %v399_v40  ;;  %v474_v47 = vadd.f32 %v683_v45, %v803_v18  ;;  %v402_v48 = vadd.f32 %v803_v18, %v401_v46  ;;  %v465_v49 = vpop.f32.mrb[7].mxu1 }
  0xf2   : > { %529 = vst [vmem:[%s808_s26 + $0xa0] sm:$0xff] %v463_v43  ;;  %516 = vst [vmem:[%s808_s26 + $0x38] sm:$0xff] %v410_v44  ;;  %v466_v50 = vadd.f32 %v803_v18, %v465_v49 }
  0xf3   : > { %532 = vst [vmem:[%s808_s26 + $0xb8] sm:$0xff] %v474_v47  ;;  %514 = vst [vmem:[%s808_s26 + $0x28] sm:$0xff] %v402_v48 }
  0xf4   : > { %530 = vst [vmem:[%s808_s26 + $0xa8] sm:$0xff] %v466_v50 }
  0xf5   : > { %v670_v51 = vpop.f32.mrb[8].mxu0 }
  0xf6   : > { %v423_v52 = vadd.f32 %v670_v51, %v803_v18  ;;  %v686_v53 = vpop.f32.mrb[8].mxu1  ;;  %v414_v54 = vpop.f32.mrb[9].mxu0 }
  0xf7   : > { %v487_v55 = vadd.f32 %v686_v53, %v803_v18  ;;  %v415_v56 = vadd.f32 %v803_v18, %v414_v54  ;;  %v478_v57 = vpop.f32.mrb[9].mxu1  ;;  %v671_v58 = vpop.f32.mrb[10].mxu0 }
  0xf8   : > { %519 = vst [vmem:[%s808_s26 + $0x50] sm:$0xff] %v423_v52  ;;  %v479_v59 = vadd.f32 %v803_v18, %v478_v57  ;;  %v426_v60 = vadd.f32 %v671_v58, %v803_v18  ;;  %v687_v61 = vpop.f32.mrb[10].mxu1  ;;  %v417_v62 = vpop.f32.mrb[11].mxu0 }
  0xf9   : > { %535 = vst [vmem:[%s808_s26 + $0xd0] sm:$0xff] %v487_v55  ;;  %517 = vst [vmem:[%s808_s26 + $0x40] sm:$0xff] %v415_v56  ;;  %v490_v63 = vadd.f32 %v687_v61, %v803_v18  ;;  %v418_v0 = vadd.f32 %v803_v18, %v417_v62  ;;  %v481_v1 = vpop.f32.mrb[11].mxu1 }
  0xfa   : > { %533 = vst [vmem:[%s808_s26 + $0xc0] sm:$0xff] %v479_v59  ;;  %520 = vst [vmem:[%s808_s26 + $0x58] sm:$0xff] %v426_v60  ;;  %v482_v2 = vadd.f32 %v803_v18, %v481_v1 }
  0xfb   : > { %536 = vst [vmem:[%s808_s26 + $0xd8] sm:$0xff] %v490_v63  ;;  %518 = vst [vmem:[%s808_s26 + $0x48] sm:$0xff] %v418_v0 }
  0xfc   : > { %534 = vst [vmem:[%s808_s26 + $0xc8] sm:$0xff] %v482_v2 }
  0xfd   : > { %v674_v3 = vpop.f32.mrb[12].mxu0 }
  0xfe   : > { %v439_v4 = vadd.f32 %v674_v3, %v803_v18  ;;  %v690_v5 = vpop.f32.mrb[12].mxu1  ;;  %v430_v6 = vpop.f32.mrb[13].mxu0 }
  0xff   : > { %v503_v7 = vadd.f32 %v690_v5, %v803_v18  ;;  %v431_v8 = vadd.f32 %v803_v18, %v430_v6  ;;  %v494_v9 = vpop.f32.mrb[13].mxu1  ;;  %v675_v10 = vpop.f32.mrb[14].mxu0 }
 0x100   : > { %523 = vst [vmem:[%s808_s26 + $0x70] sm:$0xff] %v439_v4  ;;  %v495_v11 = vadd.f32 %v803_v18, %v494_v9  ;;  %v442_v12 = vadd.f32 %v675_v10, %v803_v18  ;;  %v691_v13 = vpop.f32.mrb[14].mxu1  ;;  %v433_v14 = vpop.f32.mrb[15].mxu0 }
 0x101   : > { %539 = vst [vmem:[%s808_s26 + $0xf0] sm:$0xff] %v503_v7  ;;  %521 = vst [vmem:[%s808_s26 + $0x60] sm:$0xff] %v431_v8  ;;  %v506_v15 = vadd.f32 %v691_v13, %v803_v18  ;;  %v434_v16 = vadd.f32 %v803_v18, %v433_v14  ;;  %v497_v17 = vpop.f32.mrb[15].mxu1 }
 0x102   : > { %537 = vst [vmem:[%s808_s26 + $0xe0] sm:$0xff] %v495_v11  ;;  %524 = vst [vmem:[%s808_s26 + $0x78] sm:$0xff] %v442_v12  ;;  %v498_v19 = vadd.f32 %v803_v18, %v497_v17 }
 0x103   : > { %540 = vst [vmem:[%s808_s26 + $0xf8] sm:$0xff] %v506_v15  ;;  %522 = vst [vmem:[%s808_s26 + $0x68] sm:$0xff] %v434_v16 }
 0x104   : > { %538 = vst [vmem:[%s808_s26 + $0xe8] sm:$0xff] %v498_v19 }
 0x105 PF: > { %s13_s12 = sadd.s32 1, %s726_s12  }
 0x106   : > { %p10_p4 = scmp.ge.s32.totalorder %s13_s12, 4  }
 0x108   :  { %12 = sbr.rel (!%p10_p4) target bundleno = 1 (0x1), region = 62 }

// kernel: c2f_bottleneck_att_forward.11
= control target key start
LH: loop header
LB: loop body
LE: loop exit
PB: predicated region body
PF: predicated region fallthrough
CT: control target
= control target key end

     0   :  { %s1088_s12 = smov 0   ;;  %s1366_s0 = inlined_call_operand.vmem [shape: bf16[512,24], index: 0, kind: input, shape index: {}]   ;;  %s1367_s1 = inlined_call_operand.vmem [shape: bf16[24,128], index: 1, kind: input, shape index: {}]   ;;  %s1368_s2 = inlined_call_operand.vmem [shape: f32[1,128], index: 2, kind: input, shape index: {}]   ;;  %s1369_s3 = inlined_call_operand.vmem [shape: f32[512,128], index: 3, kind: output, shape index: {}]  }
   0x1 LB: > { %s800_s13 = sadd.s32 4294967295, %s1066_s12   ;;  %p804_p0 = scmp.ge.s32.totalorder %s1066_s12, 1  ;;  %s1066_s12 = sphi %s1088_s12, %s13_s12  }
   0x2   : > { %p138_p1 = scmp.lt.s32.totalorder %s1066_s12, 3 }
   0x4   : > { %p139_p2 = pnand %p804_p0, %p138_p1 }
   0x5   : > { %v914_v0 = vld [vmem:[%s1367_s1] sm:$0xff] (!%p139_p2)   ;;  %v915_v1 = vld [vmem:[%s1367_s1 + $0x8] ss:$0 sps:$4 sm:$0xff] (!%p139_p2)   ;;  %vm355_vm0 = vcmask (!%p139_p2), 1043456   ;;  %s805_s18 = sshll.u32 (!%p139_p2), %s800_s13, 5  ;;  %vm306_vm1 = vcmask (!%p139_p2), 195584  }
   0x6   : > { %142 = sbr.rel (%p139_p2) target bundleno = 322 (0x142), region = 32  ;;  %864 = vmatprep.subr.bf16.mxu0 (!%p139_p2), %v914_v0  ;;  %900 = vmatprep.subr.bf16.mxu1 (!%p139_p2), %v914_v0  ;;  %p163_p3 = scmp.lt.s32.totalorder (!%p139_p2), %s805_s18, 63  ;;  %v357_v2 = vsel (!%p139_p2), %vm355_vm0, %v915_v1, 0  ;;  %v1145_v19 = vld [vmem:[%s1368_s2] ss:$0 sm:$0xff] (!%p139_p2) }
   0x7   : > { %865 = vmatpush3.bf16.msra.mxu0 (!%p139_p2), %v914_v0  ;;  %902 = vmatpush3.bf16.msra.mxu1 (!%p139_p2), %v914_v0 }
   0x8   : > { %904 = vmatprep.subr.msk.bf16.mxu0 (!%p139_p2), %vm355_vm0, %v915_v1  ;;  %905 = vmatprep.subr.msk.bf16.mxu1 (!%p139_p2), %vm355_vm0, %v915_v1 }
   0xb   : > { %867 = vmatpush3.bf16.msra.mxu0 (!%p139_p2), %v357_v2  ;;  %903 = vmatpush3.bf16.msra.mxu1 (!%p139_p2), %v357_v2 }
   0xd   : > { %s1371_s18 = smov (!%p163_p3, %s805_s18), 63 }
   0xe   : > { %s806_s19 = sshll.u32 %s1371_s18, 2  ;;  %s808_s25 = sshll.u32 %s1371_s18, 3 }
   0xf   : > { %s1108_s22 = scalar_lea.vmem %s1366_s0, %s806_s19  ;;  %s1247_s28 = scalar_lea.vmem %s1369_s3, %s808_s25 }
  0x10   : > { %v916_v3 = vld [vmem:[%s1108_s22] sm:$0xff]   ;;  %v918_v5 = vld [vmem:[%s1108_s22 + $0x8] sm:$0xff]   ;;  %v920_v7 = vld [vmem:[%s1108_s22 + $0x10] sm:$0xff]  }
  0x11   : > { %v917_v4 = vld [vmem:[%s1108_s22 + $0x40] sm:$0xff]   ;;  %868 = vmatprep.mubr.msk.bf16.mxu0 %vm306_vm1, %v916_v3  ;;  %v919_v6 = vld [vmem:[%s1108_s22 + $0x48] sm:$0xff]   ;;  %v921_v8 = vld [vmem:[%s1108_s22 + $0x50] sm:$0xff]  }
  0x12   : > { %884 = vmatprep.mubr.msk.bf16.mxu1 %vm306_vm1, %v917_v4  ;;  %869 = vmatmul.mubr.msk.bf16.vlgmr.msra.gmra.mrb[0].mxu0 %vm306_vm1, %v918_v5  ;;  %v922_v9 = vld [vmem:[%s1108_s22 + $0x18] sm:$0xff]   ;;  %v924_v11 = vld [vmem:[%s1108_s22 + $0x20] sm:$0xff]   ;;  %v926_v13 = vld [vmem:[%s1108_s22 + $0x28] sm:$0xff]  }
  0x13   : > { %885 = vmatmul.mubr.msk.bf16.vlgmr.msra.gmra.mrb[0].mxu1 %vm306_vm1, %v919_v6  ;;  %872 = vmatprep.mubr.msk.bf16.mxu0 %vm306_vm1, %v920_v7  ;;  %v923_v10 = vld [vmem:[%s1108_s22 + $0x58] sm:$0xff]   ;;  %v925_v12 = vld [vmem:[%s1108_s22 + $0x60] sm:$0xff]   ;;  %v927_v14 = vld [vmem:[%s1108_s22 + $0x68] sm:$0xff]  }
  0x14   : > { %888 = vmatprep.mubr.msk.bf16.mxu1 %vm306_vm1, %v921_v8  ;;  %v928_v15 = vld [vmem:[%s1108_s22 + $0x30] sm:$0xff]   ;;  %v930_v17 = vld [vmem:[%s1108_s22 + $0x38] sm:$0xff]  }
  0x15   : > { %v929_v16 = vld [vmem:[%s1108_s22 + $0x70] sm:$0xff]   ;;  %v931_v18 = vld [vmem:[%s1108_s22 + $0x78] sm:$0xff]  }
  0x1a   : > { %873 = vmatmul.mubr.msk.bf16.gmra.mrb[4].mxu0 %vm306_vm1, %v922_v9 }
  0x1b   : > { %889 = vmatmul.mubr.msk.bf16.gmra.mrb[4].mxu1 %vm306_vm1, %v923_v10  ;;  %876 = vmatprep.mubr.msk.bf16.mxu0 %vm306_vm1, %v924_v11 }
  0x1c   : > { %892 = vmatprep.mubr.msk.bf16.mxu1 %vm306_vm1, %v925_v12 }
  0x22   : > { %877 = vmatmul.mubr.msk.bf16.gmra.mrb[8].mxu0 %vm306_vm1, %v926_v13 }
  0x23   : > { %893 = vmatmul.mubr.msk.bf16.gmra.mrb[8].mxu1 %vm306_vm1, %v927_v14  ;;  %880 = vmatprep.mubr.msk.bf16.mxu0 %vm306_vm1, %v928_v15 }
  0x24   : > { %896 = vmatprep.mubr.msk.bf16.mxu1 %vm306_vm1, %v929_v16 }
  0x2a   : > { %881 = vmatmul.mubr.msk.bf16.gmra.mrb[12].mxu0 %vm306_vm1, %v930_v17 }
  0x2b   : > { %897 = vmatmul.mubr.msk.bf16.gmra.mrb[12].mxu1 %vm306_vm1, %v931_v18 }
  0xe5   : > { %v870_v20 = vpop.f32.mrb[0].mxu0 }
  0xe6   : > { %v1148_v21 = vadd.f32 %v870_v20, %v1145_v19  ;;  %v886_v22 = vpop.f32.mrb[0].mxu1  ;;  %v393_v23 = vpop.f32.mrb[1].mxu0 }
  0xe7   : > { %v1151_v24 = vadd.f32 %v886_v22, %v1145_v19  ;;  %v1154_v25 = vadd.f32 %v1145_v19, %v393_v23  ;;  %v457_v26 = vpop.f32.mrb[1].mxu1  ;;  %v871_v27 = vpop.f32.mrb[2].mxu0 }
  0xe8   : > { %v522_v28 = vsub.f32 0.0, %v1148_v21  ;;  %v1158_v29 = vadd.f32 %v1145_v19, %v457_v26  ;;  %v1161_v30 = vadd.f32 %v871_v27, %v1145_v19  ;;  %v887_v31 = vpop.f32.mrb[2].mxu1  ;;  %v396_v32 = vpop.f32.mrb[3].mxu0 }
  0xe9   : > { %v538_v33 = vsub.f32 0.0, %v1151_v24  ;;  %v520_v34 = vsub.f32 0.0, %v1154_v25  ;;  %v1166_v35 = vadd.f32 %v887_v31, %v1145_v19  ;;  %v1169_v36 = vadd.f32 %v1145_v19, %v396_v32  ;;  %v460_v37 = vpop.f32.mrb[3].mxu1 }
  0xea   : > { %v556_v38 = vmul.f32 1.442695, %v522_v28  ;;  %v536_v39 = vsub.f32 0.0, %v1158_v29  ;;  %v523_v40 = vsub.f32 0.0, %v1161_v30  ;;  %v1174_v41 = vadd.f32 %v1145_v19, %v460_v37 }
  0xeb   : > { %v588_v42 = vmul.f32 1.442695, %v538_v33  ;;  %v552_v43 = vmul.f32 1.442695, %v520_v34  ;;  %v539_v44 = vsub.f32 0.0, %v1166_v35  ;;  %v521_v45 = vsub.f32 0.0, %v1169_v36 }
  0xec   : > { %932 = vpow2.f32 %v556_v38  ;;  %v584_v46 = vmul.f32 1.442695, %v536_v39  ;;  %v558_v47 = vmul.f32 1.442695, %v523_v40  ;;  %v537_v48 = vsub.f32 0.0, %v1174_v41 }
  0xed   : > { %934 = vpow2.f32 %v588_v42  ;;  %v590_v49 = vmul.f32 1.442695, %v539_v44  ;;  %v874_v50 = vpop.f32.mrb[4].mxu0  ;;  %v554_v51 = vmul.f32 1.442695, %v521_v45 }
  0xee   : > { %936 = vpow2.f32 %v552_v43  ;;  %v1180_v52 = vadd.f32 %v874_v50, %v1145_v19  ;;  %v890_v53 = vpop.f32.mrb[4].mxu1  ;;  %v409_v54 = vpop.f32.mrb[5].mxu0  ;;  %v586_v55 = vmul.f32 1.442695, %v537_v48 }
  0xef   : > { %938 = vpow2.f32 %v584_v46  ;;  %v1183_v56 = vadd.f32 %v890_v53, %v1145_v19  ;;  %v1186_v57 = vadd.f32 %v1145_v19, %v409_v54  ;;  %v473_v58 = vpop.f32.mrb[5].mxu1  ;;  %v875_v59 = vpop.f32.mrb[6].mxu0 }
  0xf0   : > { %940 = vpow2.f32 %v558_v47  ;;  %v526_v60 = vsub.f32 0.0, %v1180_v52  ;;  %v1190_v61 = vadd.f32 %v1145_v19, %v473_v58  ;;  %v1193_v62 = vadd.f32 %v875_v59, %v1145_v19  ;;  %v891_v63 = vpop.f32.mrb[6].mxu1  ;;  %v412_v0 = vpop.f32.mrb[7].mxu0 }
  0xf1   : > { %942 = vpow2.f32 %v590_v49  ;;  %v542_v1 = vsub.f32 0.0, %v1183_v56  ;;  %v524_v2 = vsub.f32 0.0, %v1186_v57  ;;  %v476_v3 = vpop.f32.mrb[7].mxu1  ;;  %v1200_v13 = vadd.f32 %v891_v63, %v1145_v19 }
  0xf2   : > { %944 = vpow2.f32 %v554_v51  ;;  %v564_v4 = vmul.f32 1.442695, %v526_v60  ;;  %v540_v5 = vsub.f32 0.0, %v1190_v61  ;;  %v527_v6 = vsub.f32 0.0, %v1193_v62 }
  0xf3   : > { %946 = vpow2.f32 %v586_v55  ;;  %v596_v7 = vmul.f32 1.442695, %v542_v1  ;;  %v560_v8 = vmul.f32 1.442695, %v524_v2  ;;  %v1203_v18 = vadd.f32 %v1145_v19, %v412_v0 }
  0xf4   : > { %948 = vpow2.f32 %v564_v4  ;;  %v592_v9 = vmul.f32 1.442695, %v540_v5  ;;  %v566_v10 = vmul.f32 1.442695, %v527_v6  ;;  %v1206_v27 = vadd.f32 %v1145_v19, %v476_v3 }
  0xf5   : > { %950 = vpow2.f32 %v596_v7  ;;  %v878_v11 = vpop.f32.mrb[8].mxu0  ;;  %v543_v40 = vsub.f32 0.0, %v1200_v13  ;;  %v525_v45 = vsub.f32 0.0, %v1203_v18 }
  0xf6   : > { %v933_v12 = vpop.eup %932  ;;  %952 = vpow2.f32 %v560_v8  ;;  %v894_v14 = vpop.f32.mrb[8].mxu1  ;;  %v1209_v34 = vadd.f32 %v878_v11, %v1145_v19  ;;  %v541_v48 = vsub.f32 0.0, %v1206_v27 }
  0xf7   : > { %v425_v15 = vpop.f32.mrb[9].mxu0  ;;  %v935_v16 = vpop.eup %934  ;;  %v618_v17 = vadd.f32 1.0, %v933_v12  ;;  %954 = vpow2.f32 %v592_v9  ;;  %v1213_v42 = vadd.f32 %v894_v14, %v1145_v19  ;;  %v598_v58 = vmul.f32 1.442695, %v543_v40 }
  0xf8   : > { %v489_v20 = vpop.f32.mrb[9].mxu1  ;;  %v879_v22 = vpop.f32.mrb[10].mxu0  ;;  %v634_v26 = vadd.f32 1.0, %v935_v16  ;;  %956 = vpow2.f32 %v566_v10  ;;  %v530_v51 = vsub.f32 0.0, %v1209_v34  ;;  %v562_v2 = vmul.f32 1.442695, %v525_v45 }
  0xf9   : > { %v937_v23 = vpop.eup %936  ;;  %v895_v28 = vpop.f32.mrb[10].mxu1  ;;  %958 = vrcp.f32 %v618_v17  ;;  %v546_v59 = vsub.f32 0.0, %v1213_v42  ;;  %v1222_v3 = vadd.f32 %v1145_v19, %v425_v15  ;;  %v594_v8 = vmul.f32 1.442695, %v541_v48 }
  0xfa   : > { %v428_v31 = vpop.f32.mrb[11].mxu0  ;;  %v939_v32 = vpop.eup %938  ;;  %v616_v33 = vadd.f32 1.0, %v937_v23  ;;  %960 = vrcp.f32 %v634_v26  ;;  %v1230_v9 = vadd.f32 %v1145_v19, %v489_v20  ;;  %v572_v15 = vmul.f32 1.442695, %v530_v51 }
  0xfb   : > { %v492_v37 = vpop.f32.mrb[11].mxu1  ;;  %v941_v38 = vpop.eup %940  ;;  %v632_v39 = vadd.f32 1.0, %v939_v32  ;;  %v1237_v16 = vadd.f32 %v879_v22, %v1145_v19  ;;  %v604_v32 = vmul.f32 1.442695, %v546_v59  ;;  %v1242_v20 = vadd.f32 %v895_v28, %v1145_v19 }
  0xfc   : > { %v943_v43 = vpop.eup %942  ;;  %962 = vrcp.f32 %v616_v33  ;;  %v619_v44 = vadd.f32 1.0, %v941_v38  ;;  %v528_v22 = vsub.f32 0.0, %v1222_v3  ;;  %v544_v28 = vsub.f32 0.0, %v1230_v9 }
  0xfd   : > { %v945_v46 = vpop.eup %944  ;;  %964 = vrcp.f32 %v632_v39  ;;  %v635_v47 = vadd.f32 1.0, %v943_v43  ;;  %v882_v53 = vpop.f32.mrb[12].mxu0  ;;  %v1251_v39 = vadd.f32 %v1145_v19, %v428_v31 }
  0xfe   : > { %v947_v49 = vpop.eup %946  ;;  %966 = vrcp.f32 %v619_v44  ;;  %v617_v50 = vadd.f32 1.0, %v945_v46  ;;  %v898_v60 = vpop.f32.mrb[12].mxu1  ;;  %v1256_v44 = vadd.f32 %v1145_v19, %v492_v37  ;;  %v1261_v31 = vadd.f32 %v882_v53, %v1145_v19 }
  0xff   : > { %v949_v54 = vpop.eup %948  ;;  %968 = vrcp.f32 %v635_v47  ;;  %v633_v55 = vadd.f32 1.0, %v947_v49  ;;  %v1219_v63 = vpop.f32.mrb[13].mxu0  ;;  %v531_v47 = vsub.f32 0.0, %v1237_v16  ;;  %v547_v49 = vsub.f32 0.0, %v1242_v20 }
 0x100   : > { %v951_v0 = vpop.eup %950  ;;  %970 = vrcp.f32 %v617_v50  ;;  %v622_v1 = vadd.f32 1.0, %v949_v54  ;;  %v1224_v4 = vpop.f32.mrb[13].mxu1  ;;  %v1267_v37 = vadd.f32 %v898_v60, %v1145_v19  ;;  %v568_v51 = vmul.f32 1.442695, %v528_v22 }
 0x101   : > { %v1226_v5 = vpop.f32.mrb[14].mxu0  ;;  %v953_v6 = vpop.eup %952  ;;  %972 = vrcp.f32 %v633_v55  ;;  %v638_v7 = vadd.f32 1.0, %v951_v0  ;;  %v529_v53 = vsub.f32 0.0, %v1251_v39  ;;  %v600_v55 = vmul.f32 1.442695, %v544_v28 }
 0x102   : > { %v1232_v10 = vpop.f32.mrb[14].mxu1  ;;  %v1234_v11 = vpop.f32.mrb[15].mxu0  ;;  %974 = vrcp.f32 %v622_v1  ;;  %v620_v14 = vadd.f32 1.0, %v953_v6  ;;  %v534_v0 = vsub.f32 0.0, %v1261_v31  ;;  %v550_v6 = vsub.f32 0.0, %v1267_v37 }
 0x103   : > { %v955_v12 = vpop.eup %954  ;;  %v1239_v17 = vpop.f32.mrb[15].mxu1  ;;  %976 = vrcp.f32 %v638_v7 }
 0x104   : > { %v957_v23 = vpop.eup %956  ;;  %v636_v26 = vadd.f32 1.0, %v955_v12  ;;  %978 = vrcp.f32 %v620_v14 }
 0x105   : > { %v959_v33 = vpop.eup %958  ;;  %v623_v38 = vadd.f32 1.0, %v957_v23 }
 0x106   : > { %v961_v40 = vpop.eup %960  ;;  %v682_v43 = vmul.f32 %v959_v33, %v1148_v21  ;;  %980 = vrcp.f32 %v636_v26  ;;  %v580_v26 = vmul.f32 1.442695, %v534_v0  ;;  %v612_v33 = vmul.f32 1.442695, %v550_v6 }
 0x107   : > { %v963_v45 = vpop.eup %962  ;;  %v698_v46 = vmul.f32 %v961_v40, %v1151_v24  ;;  %982 = vrcp.f32 %v623_v38 }
 0x108   : > { %v965_v48 = vpop.eup %964  ;;  %714 = vst [vmem:[%s1247_s28 + $0x10] sm:$0xff] %v682_v43  ;;  %v680_v21 = vmul.f32 %v963_v45, %v1154_v25  ;;  %984 = vpow2.f32 %v598_v58  ;;  %v545_v58 = vsub.f32 0.0, %v1256_v44 }
 0x109   : > { %v967_v50 = vpop.eup %966  ;;  %730 = vst [vmem:[%s1247_s28 + $0x90] sm:$0xff] %v698_v46  ;;  %v696_v24 = vmul.f32 %v965_v48, %v1158_v29  ;;  %986 = vpow2.f32 %v562_v2  ;;  %v574_v29 = vmul.f32 1.442695, %v531_v47  ;;  %v1297_v48 = vadd.f32 %v1145_v19, %v1219_v63 }
 0x10a   : > { %v969_v54 = vpop.eup %968  ;;  %712 = vst [vmem:[%s1247_s28] sm:$0xff] %v680_v21  ;;  %v683_v25 = vmul.f32 %v967_v50, %v1161_v30  ;;  %988 = vpow2.f32 %v594_v8  ;;  %v606_v30 = vmul.f32 1.442695, %v547_v49  ;;  %v1301_v49 = vadd.f32 %v1145_v19, %v1224_v4 }
 0x10b   : > { %v971_v59 = vpop.eup %970  ;;  %728 = vst [vmem:[%s1247_s28 + $0x80] sm:$0xff] %v696_v24  ;;  %v699_v60 = vmul.f32 %v969_v54, %v1166_v35  ;;  %990 = vpow2.f32 %v572_v15  ;;  %v570_v35 = vmul.f32 1.442695, %v529_v53  ;;  %v602_v15 = vmul.f32 1.442695, %v545_v58 }
 0x10c   : > { %v973_v1 = vpop.eup %972  ;;  %715 = vst [vmem:[%s1247_s28 + $0x18] sm:$0xff] %v683_v25  ;;  %v681_v2 = vmul.f32 %v971_v59, %v1169_v36  ;;  %992 = vpow2.f32 %v604_v32  ;;  %v1309_v63 = vadd.f32 %v1232_v10, %v1145_v19  ;;  %v532_v4 = vsub.f32 0.0, %v1297_v48 }
 0x10d   : > { %v975_v7 = vpop.eup %974  ;;  %731 = vst [vmem:[%s1247_s28 + $0x98] sm:$0xff] %v699_v60  ;;  %v697_v8 = vmul.f32 %v973_v1, %v1174_v41  ;;  %994 = vpow2.f32 %v568_v51  ;;  %v1305_v51 = vadd.f32 %v1226_v5, %v1145_v19  ;;  %v1314_v58 = vadd.f32 %v1145_v19, %v1234_v11 }
 0x10e   : > { %v977_v12 = vpop.eup %976  ;;  %713 = vst [vmem:[%s1247_s28 + $0x8] sm:$0xff] %v681_v2  ;;  %v686_v14 = vmul.f32 %v975_v7, %v1180_v52  ;;  %996 = vpow2.f32 %v600_v55  ;;  %v548_v60 = vsub.f32 0.0, %v1301_v49  ;;  %v551_v11 = vsub.f32 0.0, %v1309_v63 }
 0x10f   : > { %v979_v36 = vpop.eup %978  ;;  %729 = vst [vmem:[%s1247_s28 + $0x88] sm:$0xff] %v697_v8  ;;  %v702_v23 = vmul.f32 %v977_v12, %v1183_v56  ;;  %998 = vpow2.f32 %v574_v29  ;;  %v1319_v29 = vadd.f32 %v1145_v19, %v1239_v17  ;;  %v535_v1 = vsub.f32 0.0, %v1305_v51 }
 0x110   : > { %v981_v32 = vpop.eup %980  ;;  %718 = vst [vmem:[%s1247_s28 + $0x30] sm:$0xff] %v686_v14  ;;  %v684_v41 = vmul.f32 %v979_v36, %v1186_v57  ;;  %1000 = vpow2.f32 %v606_v30  ;;  %v576_v8 = vmul.f32 1.442695, %v532_v4  ;;  %v608_v17 = vmul.f32 1.442695, %v548_v60 }
 0x111   : > { %v983_v38 = vpop.eup %982  ;;  %734 = vst [vmem:[%s1247_s28 + $0xb0] sm:$0xff] %v702_v23  ;;  %v700_v52 = vmul.f32 %v981_v32, %v1190_v61  ;;  %1002 = vpow2.f32 %v570_v35  ;;  %v533_v35 = vsub.f32 0.0, %v1314_v58  ;;  %v549_v14 = vsub.f32 0.0, %v1319_v29 }
 0x112   : > { %v985_v22 = vpop.eup %984  ;;  %716 = vst [vmem:[%s1247_s28 + $0x20] sm:$0xff] %v684_v41  ;;  %v687_v40 = vmul.f32 %v983_v38, %v1193_v62  ;;  %1004 = vpow2.f32 %v602_v15  ;;  %v582_v23 = vmul.f32 1.442695, %v535_v1  ;;  %v614_v41 = vmul.f32 1.442695, %v551_v11 }
 0x113   : > { %v987_v56 = vpop.eup %986  ;;  %732 = vst [vmem:[%s1247_s28 + $0xa0] sm:$0xff] %v700_v52  ;;  %v639_v43 = vadd.f32 1.0, %v985_v22  ;;  %1006 = vpow2.f32 %v580_v26  ;;  %v578_v52 = vmul.f32 1.442695, %v533_v35 }
 0x114   : > { %v989_v28 = vpop.eup %988  ;;  %719 = vst [vmem:[%s1247_s28 + $0x38] sm:$0xff] %v687_v40  ;;  %v621_v57 = vadd.f32 1.0, %v987_v56  ;;  %1008 = vpow2.f32 %v612_v33  ;;  %v610_v40 = vmul.f32 1.442695, %v549_v14 }
 0x115   : > { %v991_v45 = vpop.eup %990  ;;  %1010 = vrcp.f32 %v639_v43  ;;  %v637_v46 = vadd.f32 1.0, %v989_v28 }
 0x116   : > { %v993_v47 = vpop.eup %992  ;;  %1012 = vrcp.f32 %v621_v57  ;;  %v626_v61 = vadd.f32 1.0, %v991_v45 }
 0x117   : > { %v995_v62 = vpop.eup %994  ;;  %1014 = vrcp.f32 %v637_v46  ;;  %v642_v21 = vadd.f32 1.0, %v993_v47 }
 0x118   : > { %v997_v50 = vpop.eup %996  ;;  %1016 = vrcp.f32 %v626_v61  ;;  %v624_v24 = vadd.f32 1.0, %v995_v62 }
 0x119   : > { %v999_v53 = vpop.eup %998  ;;  %1018 = vrcp.f32 %v642_v21  ;;  %v640_v54 = vadd.f32 1.0, %v997_v50 }
 0x11a   : > { %v1001_v25 = vpop.eup %1000  ;;  %1020 = vrcp.f32 %v624_v24  ;;  %v627_v55 = vadd.f32 1.0, %v999_v53 }
 0x11b   : > { %v1003_v59 = vpop.eup %1002  ;;  %1022 = vrcp.f32 %v640_v54  ;;  %v643_v5 = vadd.f32 1.0, %v1001_v25 }
 0x11c   : > { %v1005_v10 = vpop.eup %1004  ;;  %1024 = vrcp.f32 %v627_v55  ;;  %v625_v0 = vadd.f32 1.0, %v1003_v59 }
 0x11d   : > { %v1007_v2 = vpop.eup %1006  ;;  %1026 = vrcp.f32 %v643_v5  ;;  %v641_v30 = vadd.f32 1.0, %v1005_v10 }
 0x11e   : > { %v1009_v6 = vpop.eup %1008  ;;  %1028 = vrcp.f32 %v625_v0  ;;  %v630_v7 = vadd.f32 1.0, %v1007_v2 }
 0x11f   : > { %v1011_v12 = vpop.eup %1010  ;;  %1030 = vrcp.f32 %v641_v30  ;;  %v646_v19 = vadd.f32 1.0, %v1009_v6 }
 0x120   : > { %v1013_v15 = vpop.eup %1012  ;;  %v703_v36 = vmul.f32 %v1011_v12, %v1200_v13  ;;  %1032 = vrcp.f32 %v630_v7 }
 0x121   : > { %v1015_v26 = vpop.eup %1014  ;;  %v685_v32 = vmul.f32 %v1013_v15, %v1203_v18  ;;  %1034 = vrcp.f32 %v646_v19 }
 0x122   : > { %v1017_v33 = vpop.eup %1016  ;;  %735 = vst [vmem:[%s1247_s28 + $0xb8] sm:$0xff] %v703_v36  ;;  %v701_v38 = vmul.f32 %v1015_v26, %v1206_v27  ;;  %1036 = vpow2.f32 %v576_v8 }
 0x123   : > { %v1019_v22 = vpop.eup %1018  ;;  %717 = vst [vmem:[%s1247_s28 + $0x28] sm:$0xff] %v685_v32  ;;  %v690_v13 = vmul.f32 %v1017_v33, %v1209_v34  ;;  %1038 = vpow2.f32 %v608_v17 }
 0x124   : > { %v1021_v56 = vpop.eup %1020  ;;  %733 = vst [vmem:[%s1247_s28 + $0xa8] sm:$0xff] %v701_v38  ;;  %v706_v18 = vmul.f32 %v1019_v22, %v1213_v42  ;;  %1040 = vpow2.f32 %v582_v23 }
 0x125   : > { %v1023_v43 = vpop.eup %1022  ;;  %722 = vst [vmem:[%s1247_s28 + $0x50] sm:$0xff] %v690_v13  ;;  %v688_v27 = vmul.f32 %v1021_v56, %v1222_v3  ;;  %1042 = vpow2.f32 %v614_v41 }
 0x126   : > { %v1025_v28 = vpop.eup %1024  ;;  %738 = vst [vmem:[%s1247_s28 + $0xd0] sm:$0xff] %v706_v18  ;;  %v704_v34 = vmul.f32 %v1023_v43, %v1230_v9  ;;  %1044 = vpow2.f32 %v578_v52 }
 0x127   : > { %v1027_v57 = vpop.eup %1026  ;;  %720 = vst [vmem:[%s1247_s28 + $0x40] sm:$0xff] %v688_v27  ;;  %v691_v45 = vmul.f32 %v1025_v28, %v1237_v16  ;;  %1046 = vpow2.f32 %v610_v40 }
 0x128   : > { %v1029_v42 = vpop.eup %1028  ;;  %736 = vst [vmem:[%s1247_s28 + $0xc0] sm:$0xff] %v704_v34  ;;  %v707_v46 = vmul.f32 %v1027_v57, %v1242_v20 }
 0x129   : > { %v1031_v3 = vpop.eup %1030  ;;  %723 = vst [vmem:[%s1247_s28 + $0x58] sm:$0xff] %v691_v45  ;;  %v689_v47 = vmul.f32 %v1029_v42, %v1251_v39 }
 0x12a   : > { %v1033_v61 = vpop.eup %1032  ;;  %739 = vst [vmem:[%s1247_s28 + $0xd8] sm:$0xff] %v707_v46  ;;  %v705_v9 = vmul.f32 %v1031_v3, %v1256_v44 }
 0x12b   : > { %v1035_v62 = vpop.eup %1034  ;;  %721 = vst [vmem:[%s1247_s28 + $0x48] sm:$0xff] %v689_v47  ;;  %v694_v21 = vmul.f32 %v1033_v61, %v1261_v31 }
 0x12c   : > { %v1037_v16 = vpop.eup %1036  ;;  %737 = vst [vmem:[%s1247_s28 + $0xc8] sm:$0xff] %v705_v9  ;;  %v710_v50 = vmul.f32 %v1035_v62, %v1267_v37 }
 0x12d   : > { %v1039_v24 = vpop.eup %1038  ;;  %726 = vst [vmem:[%s1247_s28 + $0x70] sm:$0xff] %v694_v21  ;;  %v628_v20 = vadd.f32 1.0, %v1037_v16 }
 0x12e   : > { %v1041_v53 = vpop.eup %1040  ;;  %742 = vst [vmem:[%s1247_s28 + $0xf0] sm:$0xff] %v710_v50  ;;  %v644_v54 = vadd.f32 1.0, %v1039_v24 }
 0x12f   : > { %v1043_v25 = vpop.eup %1042  ;;  %1048 = vrcp.f32 %v628_v20  ;;  %v631_v39 = vadd.f32 1.0, %v1041_v53 }
 0x130   : > { %v1045_v55 = vpop.eup %1044  ;;  %1050 = vrcp.f32 %v644_v54  ;;  %v647_v44 = vadd.f32 1.0, %v1043_v25 }
 0x131   : > { %v1047_v4 = vpop.eup %1046  ;;  %1052 = vrcp.f32 %v631_v39  ;;  %v629_v31 = vadd.f32 1.0, %v1045_v55 }
 0x132   : > { %1054 = vrcp.f32 %v647_v44  ;;  %v645_v37 = vadd.f32 1.0, %v1047_v4 }
 0x133   : > { %1056 = vrcp.f32 %v629_v31 }
 0x134   : > { %1058 = vrcp.f32 %v645_v37 }
 0x139   : > { %v1049_v59 = vpop.eup %1048 }
 0x13a   : > { %v1051_v5 = vpop.eup %1050  ;;  %v692_v60 = vmul.f32 %v1049_v59, %v1297_v48 }
 0x13b   : > { %v1053_v10 = vpop.eup %1052  ;;  %v708_v0 = vmul.f32 %v1051_v5, %v1301_v49 }
 0x13c   : > { %v1055_v1 = vpop.eup %1054  ;;  %724 = vst [vmem:[%s1247_s28 + $0x60] sm:$0xff] %v692_v60  ;;  %v695_v2 = vmul.f32 %v1053_v10, %v1305_v51 }
 0x13d   : > { %v1057_v30 = vpop.eup %1056  ;;  %740 = vst [vmem:[%s1247_s28 + $0xe0] sm:$0xff] %v708_v0  ;;  %v711_v11 = vmul.f32 %v1055_v1, %v1309_v63 }
 0x13e   : > { %v1059_v6 = vpop.eup %1058  ;;  %727 = vst [vmem:[%s1247_s28 + $0x78] sm:$0xff] %v695_v2  ;;  %v693_v7 = vmul.f32 %v1057_v30, %v1314_v58 }
 0x13f   : > { %743 = vst [vmem:[%s1247_s28 + $0xf8] sm:$0xff] %v711_v11  ;;  %v709_v8 = vmul.f32 %v1059_v6, %v1319_v29 }
 0x140   : > { %725 = vst [vmem:[%s1247_s28 + $0x68] sm:$0xff] %v693_v7 }
 0x141   : > { %741 = vst [vmem:[%s1247_s28 + $0xe8] sm:$0xff] %v709_v8 }
 0x142 PF: > { %s13_s12 = sadd.s32 1, %s1066_s12  }
 0x143   : > { %p10_p4 = scmp.ge.s32.totalorder %s13_s12, 4  }
 0x145   :  { %12 = sbr.rel (!%p10_p4) target bundleno = 1 (0x1), region = 62 }

</bundles_post_ra>
